<compile_context>
chip_gen: v7x
topology: tpu7x:2x2x1
jax: 0.10.0
libtpu: 0.0.40
codegen_flags: <defaults>
</compile_context>

<pallas_src>
import functools
import math

import jax
import jax.numpy as jnp
from jax.experimental import pallas as pl
from jax.experimental.pallas import tpu as pltpu


# ----------------------------------------------------------------------------------- #
# helpers
# ----------------------------------------------------------------------------------- #
def _round_up(x, m):
    return ((x + m - 1) // m) * m


def _pick_tile(dim, candidates=(512, 256, 128)):
    """Largest MXU-friendly tile dividing `dim`; full dim if small; None => caller pads."""
    for c in candidates:
        if dim % c == 0:
            return c
    if dim <= 1024:
        return dim
    return None


def _row_tile(m, max_tile=512):
    """Row (sublane) tile: multiple of 8, capped at max_tile."""
    return min(max_tile, _round_up(m, 8))


def _pad_axis(x, axis, size):
    if x.shape[axis] == size:
        return x
    widths = [(0, 0)] * x.ndim
    widths[axis] = (0, size - x.shape[axis])
    return jnp.pad(x, widths)


def _pick_batch_block(B, per_batch_bytes, target_bytes=2 << 20, max_bb=8):
    """Batch-elements per grid step: amortize per-step overhead but keep >=2 grid steps
    (v7x dual TensorCore) and a bounded unroll."""
    bb = max(1, min(B, max_bb, target_bytes // max(per_batch_bytes, 1)))
    if B >= 2:
        bb = min(bb, max(B // 2, 1))
    while B % bb:
        bb -= 1
    return bb


def _detect_vmem_limit():
    """Generation-aware scoped-VMEM budget (~half of physical, capped at 64 MiB)."""
    try:
        cap = int(pltpu.get_tpu_info().vmem_capacity_bytes)
    except Exception:
        cap = 64 * 1024 * 1024
    return int(min(cap // 2, 64 * 1024 * 1024))


_VMEM_LIMIT_BYTES = _detect_vmem_limit()


def _compiler_params(dimension_semantics):
    return pltpu.CompilerParams(dimension_semantics=dimension_semantics,
                                vmem_limit_bytes=_VMEM_LIMIT_BYTES)


# ----------------------------------------------------------------------------------- #
# Pallas kernels
# ----------------------------------------------------------------------------------- #
def _linear_kernel(x_ref, w_ref, b_ref, o_ref, acc_ref, *, activation):
    """y = x @ w + b (optional ReLU), K-tiled with an f32 VMEM accumulator."""
    k = pl.program_id(2)

    @pl.when(k == 0)
    def _():
        acc_ref[...] = jnp.zeros_like(acc_ref)

    acc_ref[...] += jnp.dot(x_ref[...], w_ref[...], preferred_element_type=jnp.float32)

    @pl.when(k == pl.num_programs(2) - 1)
    def _():
        y = acc_ref[...] + b_ref[...].astype(jnp.float32)
        if activation == "relu":
            y = jnp.maximum(y, 0.0)
        o_ref[...] = y.astype(o_ref.dtype)


def linear(x, w, b, activation=None, out_dtype=None, max_tm=512):
    """x: (M, K), w: (K, N), b: (N,) -> (M, N). Pads M (and K/N when needed)."""
    M, K = x.shape
    N = w.shape[1]
    out_dtype = out_dtype if out_dtype is not None else x.dtype

    tm = _row_tile(M, max_tm)
    m_pad = _round_up(M, tm)
    xp = _pad_axis(x, 0, m_pad)

    tk = _pick_tile(K)
    if tk is None:                                   # large, not 128-aligned: zero-pad K
        tk = 256
        kp = _round_up(K, tk)
        xp = _pad_axis(xp, 1, kp)
        w = _pad_axis(w, 0, kp)
    tn = _pick_tile(N)
    n_out = N
    if tn is None:                                   # large, not 128-aligned: zero-pad N
        tn = 256
        n_out = _round_up(N, tn)
        w = _pad_axis(w, 1, n_out)
        b = _pad_axis(b, 0, n_out)

    kernel = functools.partial(_linear_kernel, activation=activation)
    out = pl.pallas_call(
        kernel,
        out_shape=jax.ShapeDtypeStruct((m_pad, n_out), out_dtype),
        grid=(m_pad // tm, n_out // tn, w.shape[0] // tk),
        in_specs=[
            pl.BlockSpec((tm, tk), lambda i, j, k: (i, k)),
            pl.BlockSpec((tk, tn), lambda i, j, k: (k, j)),
            pl.BlockSpec((1, tn), lambda i, j, k: (0, j)),
        ],
        out_specs=pl.BlockSpec((tm, tn), lambda i, j, k: (i, j)),
        scratch_shapes=[pltpu.VMEM((tm, tn), jnp.float32)],
        compiler_params=_compiler_params(("parallel", "parallel", "arbitrary")),
    )(xp, w, b.reshape(1, -1))
    if m_pad != M or n_out != N:
        out = out[:M, :N]
    return out


def _linear_res_ln_kernel(x_ref, w_ref, b_ref, r_ref, g_ref, bt_ref, o_ref, acc_ref, *, eps):
    """LayerNorm(residual + (x @ w + b)); K-tiled accumulation, N is one full block."""
    k = pl.program_id(1)

    @pl.when(k == 0)
    def _():
        acc_ref[...] = jnp.zeros_like(acc_ref)

    acc_ref[...] += jnp.dot(x_ref[...], w_ref[...], preferred_element_type=jnp.float32)

    @pl.when(k == pl.num_programs(1) - 1)
    def _():
        y = (acc_ref[...] + b_ref[...].astype(jnp.float32)
             + r_ref[...].astype(jnp.float32))
        mu = jnp.mean(y, axis=-1, keepdims=True)
        var = jnp.mean((y - mu) * (y - mu), axis=-1, keepdims=True)
        o_ref[...] = ((y - mu) * jax.lax.rsqrt(var + eps) * g_ref[...].astype(jnp.float32)
                      + bt_ref[...].astype(jnp.float32)).astype(o_ref.dtype)


def linear_res_layernorm(x, w, b, residual, gamma, beta, eps=1e-5, out_dtype=None, max_tm=512):
    M, K = x.shape
    N = w.shape[1]
    out_dtype = out_dtype if out_dtype is not None else residual.dtype

    tm = _row_tile(M, max_tm)
    m_pad = _round_up(M, tm)
    xp = _pad_axis(x, 0, m_pad)
    rp = _pad_axis(residual, 0, m_pad)

    tk = _pick_tile(K)
    if tk is None:
        tk = 256
        kp = _round_up(K, tk)
        xp = _pad_axis(xp, 1, kp)
        w = _pad_axis(w, 0, kp)

    kernel = functools.partial(_linear_res_ln_kernel, eps=eps)
    out = pl.pallas_call(
        kernel,
        out_shape=jax.ShapeDtypeStruct((m_pad, N), out_dtype),
        grid=(m_pad // tm, w.shape[0] // tk),
        in_specs=[
            pl.BlockSpec((tm, tk), lambda i, k: (i, k)),
            pl.BlockSpec((tk, N), lambda i, k: (k, 0)),
            pl.BlockSpec((1, N), lambda i, k: (0, 0)),
            pl.BlockSpec((tm, N), lambda i, k: (i, 0)),
            pl.BlockSpec((1, N), lambda i, k: (0, 0)),
            pl.BlockSpec((1, N), lambda i, k: (0, 0)),
        ],
        out_specs=pl.BlockSpec((tm, N), lambda i, k: (i, 0)),
        scratch_shapes=[pltpu.VMEM((tm, N), jnp.float32)],
        compiler_params=_compiler_params(("parallel", "arbitrary")),
    )(xp, w, b.reshape(1, N), rp, gamma.reshape(1, N), beta.reshape(1, N))
    return out[:M] if m_pad != M else out


def _ffn_res_ln_kernel(x_ref, w1_ref, b1_ref, w2_ref, b2_ref, g_ref, bt_ref, o_ref, acc_ref,
                       *, eps):
    """LayerNorm(x + fc2(relu(fc1(x)))), PF-chunked: acc += relu(x@W1[:,p]+b1[p]) @ W2[p,:].

    The (tm, PF) hidden activation is never materialized; x doubles as the residual.
    """
    p = pl.program_id(1)

    @pl.when(p == 0)
    def _():
        acc_ref[...] = jnp.zeros_like(acc_ref)

    h = jnp.dot(x_ref[...], w1_ref[...], preferred_element_type=jnp.float32)
    h = jnp.maximum(h + b1_ref[...].astype(jnp.float32), 0.0)
    acc_ref[...] += jnp.dot(h.astype(w2_ref.dtype), w2_ref[...],
                            preferred_element_type=jnp.float32)

    @pl.when(p == pl.num_programs(1) - 1)
    def _():
        y = (acc_ref[...] + b2_ref[...].astype(jnp.float32)
             + x_ref[...].astype(jnp.float32))
        mu = jnp.mean(y, axis=-1, keepdims=True)
        var = jnp.mean((y - mu) * (y - mu), axis=-1, keepdims=True)
        o_ref[...] = ((y - mu) * jax.lax.rsqrt(var + eps) * g_ref[...].astype(jnp.float32)
                      + bt_ref[...].astype(jnp.float32)).astype(o_ref.dtype)


def ffn_res_layernorm(x, w1, b1, w2, b2, gamma, beta, eps=1e-5, out_dtype=None, max_tm=512):
    M, D = x.shape
    PF = w1.shape[1]
    out_dtype = out_dtype if out_dtype is not None else x.dtype

    tm = _row_tile(M, max_tm)
    m_pad = _round_up(M, tm)
    xp = _pad_axis(x, 0, m_pad)

    tpf = _pick_tile(PF)
    if tpf is None:                                  # zero-padded PF chunks contribute 0
        tpf = 512
        pfp = _round_up(PF, tpf)
        w1 = _pad_axis(w1, 1, pfp)
        b1 = _pad_axis(b1, 0, pfp)
        w2 = _pad_axis(w2, 0, pfp)

    kernel = functools.partial(_ffn_res_ln_kernel, eps=eps)
    out = pl.pallas_call(
        kernel,
        out_shape=jax.ShapeDtypeStruct((m_pad, D), out_dtype),
        grid=(m_pad // tm, w1.shape[1] // tpf),
        in_specs=[
            pl.BlockSpec((tm, D), lambda i, p: (i, 0)),
            pl.BlockSpec((D, tpf), lambda i, p: (0, p)),
            pl.BlockSpec((1, tpf), lambda i, p: (0, p)),
            pl.BlockSpec((tpf, D), lambda i, p: (p, 0)),
            pl.BlockSpec((1, D), lambda i, p: (0, 0)),
            pl.BlockSpec((1, D), lambda i, p: (0, 0)),
            pl.BlockSpec((1, D), lambda i, p: (0, 0)),
        ],
        out_specs=pl.BlockSpec((tm, D), lambda i, p: (i, 0)),
        scratch_shapes=[pltpu.VMEM((tm, D), jnp.float32)],
        compiler_params=_compiler_params(("parallel", "arbitrary")),
    )(xp, w1, b1.reshape(1, -1), w2, b2.reshape(1, D), gamma.reshape(1, D), beta.reshape(1, D))
    return out[:M] if m_pad != M else out


def _attention_kernel(qkv_ref, m_ref, o_ref, *, n_heads, scale):
    """Self-attention for a block of Bb batch elements from the fused (Bb, S, 3D) QKV slab.

    Per batch element: one mask compare, head-batched dot_generals (H as the batch dim),
    and one lane-dense store of the merged heads. No HBM head transposes.
    """
    bb, s, d3 = qkv_ref.shape
    d = d3 // 3
    dh = d // n_heads
    inv_scale = 1.0 / scale

    for b in range(bb):                                   # small, unrolled
        qkv = qkv_ref[b]                                  # (S, 3D)
        qh = jnp.stack([qkv[:, h * dh:(h + 1) * dh] for h in range(n_heads)], axis=0)
        kh = jnp.stack([qkv[:, d + h * dh:d + (h + 1) * dh] for h in range(n_heads)], axis=0)
        vh = jnp.stack([qkv[:, 2 * d + h * dh:2 * d + (h + 1) * dh] for h in range(n_heads)],
                       axis=0)                            # (H, S, Dh)

        e = jax.lax.dot_general(qh, kh, (((2,), (2,)), ((0,), (0,))),
                                preferred_element_type=jnp.float32) * inv_scale   # (H, S, S)
        mask = m_ref[b, 0]                                # (1, S) — compared once per b
        e = jnp.where((mask == 0.0)[None], -1e10, e)
        e = e - jnp.max(e, axis=-1, keepdims=True)
        p = jnp.exp(e)
        p = p * pl.reciprocal(jnp.sum(p, axis=-1, keepdims=True), approx=True)
        ctx = jax.lax.dot_general(p.astype(vh.dtype), vh, (((2,), (1,)), ((0,), (0,))),
                                  preferred_element_type=jnp.float32)             # (H, S, Dh)
        o_ref[b] = jnp.concatenate([ctx[h] for h in range(n_heads)],
                                   axis=-1).astype(o_ref.dtype)


def attention(qkv, mask, n_heads, scale):
    """qkv: (B, S, 3D) fused projections, mask: (B, 1, 1, S) -> context (B, S, D)."""
    B, S, D3 = qkv.shape
    D = D3 // 3
    bb = _pick_batch_block(B, S * (D3 + D) * qkv.dtype.itemsize)
    kernel = functools.partial(_attention_kernel, n_heads=n_heads, scale=scale)
    return pl.pallas_call(
        kernel,
        out_shape=jax.ShapeDtypeStruct((B, S, D), qkv.dtype),
        grid=(B // bb,),
        in_specs=[
            pl.BlockSpec((bb, S, D3), lambda i: (i, 0, 0)),
            pl.BlockSpec((bb, 1, 1, S), lambda i: (i, 0, 0, 0)),
        ],
        out_specs=pl.BlockSpec((bb, S, D), lambda i: (i, 0, 0)),
        compiler_params=_compiler_params(("parallel",)),
    )(qkv, mask)


def _embed_qkv_kernel(src_ref, pos_ref, w_ref, b_ref, qkv_ref, x_ref, *, scale):
    """x = src * sqrt(D) + pos ; qkv = x @ W_qkv + b_qkv — fused, two outputs."""
    x = src_ref[...].astype(jnp.float32) * scale + pos_ref[...][None].astype(jnp.float32)
    x_ref[...] = x.astype(x_ref.dtype)
    bb, s, d = src_ref.shape
    x2 = x.astype(w_ref.dtype).reshape(bb * s, d)
    qkv = jnp.dot(x2, w_ref[...], preferred_element_type=jnp.float32) \
        + b_ref[...].astype(jnp.float32)
    qkv_ref[...] = qkv.reshape(bb, s, w_ref.shape[1]).astype(qkv_ref.dtype)


def embed_qkv(src, posemb, w_qkv, b_qkv, scale, compute_dtype):
    """Fused embed(scale+pos) + first-layer QKV projection. Returns (qkv, x)."""
    B, S, D = src.shape
    D3 = w_qkv.shape[1]
    if D * D3 * w_qkv.dtype.itemsize > 8 * 1024 * 1024:
        # Weight slab too big to hold whole in VMEM: fall back to embed + K-tiled linear.
        x = embed_scale_add(src, posemb, scale, out_dtype=compute_dtype)
        qkv = linear(x.reshape(B * S, D), w_qkv, b_qkv, out_dtype=compute_dtype)
        return qkv.reshape(B, S, D3), x
    bb = _pick_batch_block(B, S * (2 * D + D3) * 4)
    kernel = functools.partial(_embed_qkv_kernel, scale=scale)
    qkv, x = pl.pallas_call(
        kernel,
        out_shape=(jax.ShapeDtypeStruct((B, S, D3), compute_dtype),
                   jax.ShapeDtypeStruct((B, S, D), compute_dtype)),
        grid=(B // bb,),
        in_specs=[
            pl.BlockSpec((bb, S, D), lambda i: (i, 0, 0)),
            pl.BlockSpec((S, D), lambda i: (0, 0)),
            pl.BlockSpec((D, D3), lambda i: (0, 0)),
            pl.BlockSpec((1, D3), lambda i: (0, 0)),
        ],
        out_specs=(pl.BlockSpec((bb, S, D3), lambda i: (i, 0, 0)),
                   pl.BlockSpec((bb, S, D), lambda i: (i, 0, 0))),
        compiler_params=_compiler_params(("parallel",)),
    )(src, posemb, w_qkv, b_qkv.reshape(1, D3))
    return qkv, x


def _embed_kernel(s_ref, p_ref, o_ref, *, scale):
    o_ref[...] = (s_ref[...].astype(jnp.float32) * scale
                  + p_ref[...][None].astype(jnp.float32)).astype(o_ref.dtype)


def embed_scale_add(src, posemb, scale, out_dtype=jnp.float32):
    """src * sqrt(hid_dim) + pos_embedding[arange(S)]  (fallback path only)."""
    B, S, D = src.shape
    bb = _pick_batch_block(B, 2 * S * D * 4)
    kernel = functools.partial(_embed_kernel, scale=scale)
    return pl.pallas_call(
        kernel,
        out_shape=jax.ShapeDtypeStruct((B, S, D), out_dtype),
        grid=(B // bb,),
        in_specs=[
            pl.BlockSpec((bb, S, D), lambda i: (i, 0, 0)),
            pl.BlockSpec((S, D), lambda i: (0, 0)),
        ],
        out_specs=pl.BlockSpec((bb, S, D), lambda i: (i, 0, 0)),
        compiler_params=_compiler_params(("parallel",)),
    )(src, posemb)


# ----------------------------------------------------------------------------------- #
# Model wiring (dropout == identity, eval semantics)
# ----------------------------------------------------------------------------------- #
def encoder_forward(params, src, key_pad_mask, n_heads, compute_dtype=None):
    """NoMaskTransformerEncoder.forward. src: (B, S, D) f32, key_pad_mask: (B, 1, 1, S)."""
    B, S, D = src.shape
    if compute_dtype is None:
        compute_dtype = params["layers"][0]["w_qkv"].dtype   # weights define the HBM dtype
    src_mask = key_pad_mask                                   # _make_src_mask is a clone
    posemb = params["pos_emb"][:S]
    attn_scale = math.sqrt(D // n_heads)
    n_layers = len(params["layers"])

    x = None
    for li, lp in enumerate(params["layers"]):
        if li == 0:
            # embed (scale + pos add) fused into the first QKV projection
            qkv, x = embed_qkv(src, posemb, lp["w_qkv"], lp["b_qkv"],
                               math.sqrt(D), compute_dtype)
        else:
            qkv = linear(x.reshape(B * S, D), lp["w_qkv"], lp["b_qkv"],
                         out_dtype=compute_dtype).reshape(B, S, 3 * D)

        ctx = attention(qkv, src_mask, n_heads, attn_scale)           # (B, S, D)

        src1 = linear_res_layernorm(ctx.reshape(B * S, D), lp["wo"], lp["bo"],
                                    residual=x.reshape(B * S, D),
                                    gamma=lp["ln1_g"], beta=lp["ln1_b"],
                                    out_dtype=compute_dtype)

        is_last = li == n_layers - 1
        x = ffn_res_layernorm(src1, lp["w1"], lp["b1"], lp["w2"], lp["b2"],
                              gamma=lp["ln2_g"], beta=lp["ln2_b"],
                              out_dtype=jnp.float32 if is_last else compute_dtype
                              ).reshape(B, S, D)
    return x, src_mask


# ----------------------------------------------------------------------------------- #
# Parameter construction (mirrors nn.Module shapes; Wq/Wk/Wv pre-concatenated)
# ----------------------------------------------------------------------------------- #
def _linear_params(key, fan_in, fan_out):
    kw, kb = jax.random.split(key)
    bound = 1.0 / math.sqrt(fan_in)
    w = jax.random.uniform(kw, (fan_in, fan_out), jnp.float32, -bound, bound)
    b = jax.random.uniform(kb, (fan_out,), jnp.float32, -bound, bound)
    return w, b


def make_params(key, hid_dim, n_layers, pf_dim, max_length):
    keys = jax.random.split(key, n_layers + 1)
    params = {"pos_emb": jax.random.normal(keys[0], (max_length, hid_dim), jnp.float32)}
    layers = []
    for li in range(n_layers):
        sub = jax.random.split(keys[li + 1], 6)
        wq, bq = _linear_params(sub[0], hid_dim, hid_dim)
        wk, bk = _linear_params(sub[1], hid_dim, hid_dim)
        wv, bv = _linear_params(sub[2], hid_dim, hid_dim)
        wo, bo = _linear_params(sub[3], hid_dim, hid_dim)
        w1, b1 = _linear_params(sub[4], hid_dim, pf_dim)
        w2, b2 = _linear_params(sub[5], pf_dim, hid_dim)
        layers.append({
            "w_qkv": jnp.concatenate([wq, wk, wv], axis=1),
            "b_qkv": jnp.concatenate([bq, bk, bv], axis=0),
            "wo": wo, "bo": bo, "w1": w1, "b1": b1, "w2": w2, "b2": b2,
            "ln1_g": jnp.ones((hid_dim,), jnp.float32),
            "ln1_b": jnp.zeros((hid_dim,), jnp.float32),
            "ln2_g": jnp.ones((hid_dim,), jnp.float32),
            "ln2_b": jnp.zeros((hid_dim,), jnp.float32),
        })
    params["layers"] = layers
    return params


def cast_params(params, dtype):
    """Cast all parameters once so HBM holds them in the compute dtype (bf16 path)."""
    return jax.tree_util.tree_map(lambda a: a.astype(dtype), params)


# ----------------------------------------------------------------------------------- #
# Pure-JAX reference for correctness
# ----------------------------------------------------------------------------------- #
def reference_forward(params, src, mask, n_heads):
    B, S, D = src.shape
    Dh = D // n_heads
    x = src * math.sqrt(D) + params["pos_emb"][:S][None]
    for lp in params["layers"]:
        x2 = x.reshape(B * S, D)
        wq, wk, wv = jnp.split(lp["w_qkv"], 3, axis=1)
        bq, bk, bv = jnp.split(lp["b_qkv"], 3, axis=0)
        q = (x2 @ wq + bq).reshape(B, S, n_heads, Dh).transpose(0, 2, 1, 3)
        k = (x2 @ wk + bk).reshape(B, S, n_heads, Dh).transpose(0, 2, 1, 3)
        v = (x2 @ wv + bv).reshape(B, S, n_heads, Dh).transpose(0, 2, 1, 3)
        energy = jnp.einsum("bhqd,bhkd->bhqk", q, k) / math.sqrt(Dh)
        energy = jnp.where(mask == 0, -1e10, energy)
        p = jax.nn.softmax(energy, axis=-1)
        a = jnp.einsum("bhqk,bhkd->bhqd", p, v).transpose(0, 2, 1, 3).reshape(B * S, D)
        _src = a @ lp["wo"] + lp["bo"]
        y = x2 + _src
        mu = y.mean(-1, keepdims=True)
        var = ((y - mu) ** 2).mean(-1, keepdims=True)
        src1 = (y - mu) / jnp.sqrt(var + 1e-5) * lp["ln1_g"] + lp["ln1_b"]
        ff = jnp.maximum(src1 @ lp["w1"] + lp["b1"], 0.0) @ lp["w2"] + lp["b2"]
        y2 = src1 + ff
        mu2 = y2.mean(-1, keepdims=True)
        var2 = ((y2 - mu2) ** 2).mean(-1, keepdims=True)
        x = ((y2 - mu2) / jnp.sqrt(var2 + 1e-5) * lp["ln2_g"] + lp["ln2_b"]).reshape(B, S, D)
    return x


# ----------------------------------------------------------------------------------- #
if __name__ == "__main__":
    B, S, HID, HEADS, PF, LAYERS, MAXLEN = 2, 8, 32, 4, 64, 2, 100

    key = jax.random.PRNGKey(0)
    k_params, k_src = jax.random.split(key)
    params = make_params(k_params, HID, LAYERS, PF, MAXLEN)

    src = jax.random.normal(k_src, (B, S, HID), jnp.float32)
    key_pad_mask = jnp.ones((B, 1, 1, S), jnp.float32)   # no padding masked out

    fwd = jax.jit(functools.partial(encoder_forward, n_heads=HEADS))

    # f32-in-HBM path (exact parity check against the pure-JAX reference)
    out, out_mask = fwd(params, src, key_pad_mask)
    out = jax.block_until_ready(out)

    ref = reference_forward(params, src, key_pad_mask, HEADS)
    assert out.shape == (B, S, HID) and out_mask.shape == key_pad_mask.shape
    assert jnp.allclose(out, ref, atol=5e-3, rtol=5e-3), "mismatch vs pure-JAX reference"

    # bf16-in-HBM path (weights + inter-layer activations stored bf16; acc/LN math in f32)
    params_bf16 = cast_params(params, jnp.bfloat16)
    out_bf16, _ = fwd(params_bf16, src, key_pad_mask)
    out_bf16 = jax.block_until_ready(out_bf16)
    assert bool(jnp.all(jnp.isfinite(out_bf16)))
    assert float(jnp.max(jnp.abs(out_bf16.astype(jnp.float32) - ref))) < 0.25

    print("KERNEL_OK")
</pallas_src>

<mosaic_0001>
module attributes {stable_mosaic.version = 11 : i64} {
  func.func @_embed_qkv_kernel(%arg0: i32, %arg1: memref<1x8x32xf32, #tpu.memory_space<vmem>>, %arg2: memref<8x32xf32, #tpu.memory_space<vmem>>, %arg3: memref<32x96xf32, #tpu.memory_space<vmem>>, %arg4: memref<1x96xf32, #tpu.memory_space<vmem>>, %arg5: memref<1x8x96xf32, #tpu.memory_space<vmem>>, %arg6: memref<1x8x32xf32, #tpu.memory_space<vmem>>) attributes {dimension_semantics = [#tpu.dimension_semantics<parallel>], iteration_bounds = array<i64: 2>, scalar_prefetch = 0 : i64, scratch_operands = 0 : i64, tpu.core_type = #tpu.core_type<tc>, window_params = [{transform_indices = @transform_0, window_bounds = array<i64: 1, 8, 32>}, {pipeline_mode = #tpu.pipeline_mode<synchronous>, transform_indices = @transform_1, window_bounds = array<i64: 8, 32>}, {pipeline_mode = #tpu.pipeline_mode<synchronous>, transform_indices = @transform_2, window_bounds = array<i64: 32, 96>}, {pipeline_mode = #tpu.pipeline_mode<synchronous>, transform_indices = @transform_3, window_bounds = array<i64: 1, 96>}, {transform_indices = @transform_4, window_bounds = array<i64: 1, 8, 96>}, {transform_indices = @transform_5, window_bounds = array<i64: 1, 8, 32>}]} {
    %c0 = arith.constant 0 : index
    %c0_0 = arith.constant 0 : index
    %c0_1 = arith.constant 0 : index
    %0 = vector.load %arg1[%c0, %c0_0, %c0_1] : memref<1x8x32xf32, #tpu.memory_space<vmem>>, vector<1x8x32xf32>
    %cst = arith.constant 5.65685415 : f32
    %1 = vector.broadcast %cst : f32 to vector<1x8x32xf32>
    %2 = arith.mulf %0, %1 : vector<1x8x32xf32>
    %c0_2 = arith.constant 0 : index
    %c0_3 = arith.constant 0 : index
    %3 = vector.load %arg2[%c0_2, %c0_3] : memref<8x32xf32, #tpu.memory_space<vmem>>, vector<8x32xf32>
    %4 = vector.shape_cast %3 : vector<8x32xf32> to vector<1x8x32xf32>
    %5 = arith.addf %2, %4 : vector<1x8x32xf32>
    %c0_4 = arith.constant 0 : index
    %c0_5 = arith.constant 0 : index
    %c0_6 = arith.constant 0 : index
    %6 = vector.load %arg6[%c0_4, %c0_5, %c0_6] : memref<1x8x32xf32, #tpu.memory_space<vmem>>, vector<1x8x32xf32>
    tpu.vector_store %arg6[%c0_4, %c0_5, %c0_6], %5 {strides = array<i32>} : memref<1x8x32xf32, #tpu.memory_space<vmem>>, vector<1x8x32xf32>,
    %7 = vector.shape_cast %5 : vector<1x8x32xf32> to vector<8x32xf32>
    %c0_7 = arith.constant 0 : index
    %c0_8 = arith.constant 0 : index
    %8 = vector.load %arg3[%c0_7, %c0_8] : memref<32x96xf32, #tpu.memory_space<vmem>>, vector<32x96xf32>
    %cst_9 = arith.constant dense<0.000000e+00> : vector<8x96xf32>
    %9 = tpu.matmul %7, %8, %cst_9 {dimension_numbers = #tpu.dot_dimension_numbers<[1], [0], [0], [1], [0, 0, 1, 1], [], []>} : vector<8x32xf32>, vector<32x96xf32>, vector<8x96xf32> -> vector<8x96xf32>
    %c0_10 = arith.constant 0 : index
    %c0_11 = arith.constant 0 : index
    %10 = vector.load %arg4[%c0_10, %c0_11] : memref<1x96xf32, #tpu.memory_space<vmem>>, vector<1x96xf32>
    %11 = vector.broadcast %10 : vector<1x96xf32> to vector<8x96xf32>
    %12 = arith.addf %9, %11 : vector<8x96xf32>
    %13 = vector.shape_cast %12 : vector<8x96xf32> to vector<1x8x96xf32>
    %c0_12 = arith.constant 0 : index
    %c0_13 = arith.constant 0 : index
    %c0_14 = arith.constant 0 : index
    %14 = vector.load %arg5[%c0_12, %c0_13, %c0_14] : memref<1x8x96xf32, #tpu.memory_space<vmem>>, vector<1x8x96xf32>
    tpu.vector_store %arg5[%c0_12, %c0_13, %c0_14], %13 {strides = array<i32>} : memref<1x8x96xf32, #tpu.memory_space<vmem>>, vector<1x8x96xf32>,
    return
  }
  func.func @transform_0(%arg0: i32) -> (i32, i32, i32) {
    %c0_i32 = arith.constant 0 : i32
    %c0_i32_0 = arith.constant 0 : i32
    %c0_i32_1 = arith.constant 0 : i32
    return %arg0, %c0_i32, %c0_i32_0 : i32, i32, i32
  }
  func.func @transform_1(%arg0: i32) -> (i32, i32) {
    %c0_i32 = arith.constant 0 : i32
    %c0_i32_0 = arith.constant 0 : i32
    %c0_i32_1 = arith.constant 0 : i32
    return %c0_i32, %c0_i32_0 : i32, i32
  }
  func.func @transform_2(%arg0: i32) -> (i32, i32) {
    %c0_i32 = arith.constant 0 : i32
    %c0_i32_0 = arith.constant 0 : i32
    %c0_i32_1 = arith.constant 0 : i32
    return %c0_i32, %c0_i32_0 : i32, i32
  }
  func.func @transform_3(%arg0: i32) -> (i32, i32) {
    %c0_i32 = arith.constant 0 : i32
    %c0_i32_0 = arith.constant 0 : i32
    %c0_i32_1 = arith.constant 0 : i32
    return %c0_i32, %c0_i32_0 : i32, i32
  }
  func.func @transform_4(%arg0: i32) -> (i32, i32, i32) {
    %c0_i32 = arith.constant 0 : i32
    %c0_i32_0 = arith.constant 0 : i32
    %c0_i32_1 = arith.constant 0 : i32
    return %arg0, %c0_i32, %c0_i32_0 : i32, i32, i32
  }
  func.func @transform_5(%arg0: i32) -> (i32, i32, i32) {
    %c0_i32 = arith.constant 0 : i32
    %c0_i32_0 = arith.constant 0 : i32
    %c0_i32_1 = arith.constant 0 : i32
    return %arg0, %c0_i32, %c0_i32_0 : i32, i32, i32
  }
}

module attributes {stable_mosaic.version = 11 : i64} {
  func.func @_linear_res_ln_kernel(%arg0: i32, %arg1: i32, %arg2: memref<16x32xf32, #tpu.memory_space<vmem>>, %arg3: memref<32x32xf32, #tpu.memory_space<vmem>>, %arg4: memref<1x32xf32, #tpu.memory_space<vmem>>, %arg5: memref<16x32xf32, #tpu.memory_space<vmem>>, %arg6: memref<1x32xf32, #tpu.memory_space<vmem>>, %arg7: memref<1x32xf32, #tpu.memory_space<vmem>>, %arg8: memref<16x32xf32, #tpu.memory_space<vmem>>, %arg9: memref<16x32xf32, #tpu.memory_space<vmem>>) attributes {dimension_semantics = [#tpu.dimension_semantics<parallel>, #tpu.dimension_semantics<arbitrary>], iteration_bounds = array<i64: 1, 1>, scalar_prefetch = 0 : i64, scratch_operands = 1 : i64, tpu.core_type = #tpu.core_type<tc>, window_params = [{transform_indices = @transform_0, window_bounds = array<i64: 16, 32>}, {transform_indices = @transform_1, window_bounds = array<i64: 32, 32>}, {pipeline_mode = #tpu.pipeline_mode<synchronous>, transform_indices = @transform_2, window_bounds = array<i64: 1, 32>}, {transform_indices = @transform_3, window_bounds = array<i64: 16, 32>}, {pipeline_mode = #tpu.pipeline_mode<synchronous>, transform_indices = @transform_4, window_bounds = array<i64: 1, 32>}, {pipeline_mode = #tpu.pipeline_mode<synchronous>, transform_indices = @transform_5, window_bounds = array<i64: 1, 32>}, {transform_indices = @transform_6, window_bounds = array<i64: 16, 32>}]} {
    %c0_i32 = arith.constant 0 : i32
    %0 = arith.cmpi eq, %arg1, %c0_i32 : i32
    %1 = arith.extui %0 : i1 to i32
    %c0_i32_0 = arith.constant 0 : i32
    %2 = arith.cmpi ne, %1, %c0_i32_0 : i32
    scf.if %2 {
      %cst_10 = arith.constant 0.000000e+00 : f32
      %12 = vector.broadcast %cst_10 : f32 to vector<16x32xf32>
      %c0_11 = arith.constant 0 : index
      %c0_12 = arith.constant 0 : index
      %13 = vector.load %arg9[%c0_11, %c0_12] : memref<16x32xf32, #tpu.memory_space<vmem>>, vector<16x32xf32>
      tpu.vector_store %arg9[%c0_11, %c0_12], %12 {strides = array<i32>} : memref<16x32xf32, #tpu.memory_space<vmem>>, vector<16x32xf32>,
    } else {
    }
    %c0 = arith.constant 0 : index
    %c0_1 = arith.constant 0 : index
    %3 = vector.load %arg9[%c0, %c0_1] : memref<16x32xf32, #tpu.memory_space<vmem>>, vector<16x32xf32>
    %c0_2 = arith.constant 0 : index
    %c0_3 = arith.constant 0 : index
    %4 = vector.load %arg2[%c0_2, %c0_3] : memref<16x32xf32, #tpu.memory_space<vmem>>, vector<16x32xf32>
    %c0_4 = arith.constant 0 : index
    %c0_5 = arith.constant 0 : index
    %5 = vector.load %arg3[%c0_4, %c0_5] : memref<32x32xf32, #tpu.memory_space<vmem>>, vector<32x32xf32>
    %cst = arith.constant dense<0.000000e+00> : vector<16x32xf32>
    %6 = tpu.matmul %4, %5, %cst {dimension_numbers = #tpu.dot_dimension_numbers<[1], [0], [0], [1], [0, 0, 1, 1], [], []>} : vector<16x32xf32>, vector<32x32xf32>, vector<16x32xf32> -> vector<16x32xf32>
    %7 = arith.addf %3, %6 : vector<16x32xf32>
    %c0_6 = arith.constant 0 : index
    %c0_7 = arith.constant 0 : index
    %8 = vector.load %arg9[%c0_6, %c0_7] : memref<16x32xf32, #tpu.memory_space<vmem>>, vector<16x32xf32>
    tpu.vector_store %arg9[%c0_6, %c0_7], %7 {strides = array<i32>} : memref<16x32xf32, #tpu.memory_space<vmem>>, vector<16x32xf32>,
    %c0_i32_8 = arith.constant 0 : i32
    %9 = arith.cmpi eq, %arg1, %c0_i32_8 : i32
    %10 = arith.extui %9 : i1 to i32
    %c0_i32_9 = arith.constant 0 : i32
    %11 = arith.cmpi ne, %10, %c0_i32_9 : i32
    scf.if %11 {
      %c0_10 = arith.constant 0 : index
      %c0_11 = arith.constant 0 : index
      %12 = vector.load %arg9[%c0_10, %c0_11] : memref<16x32xf32, #tpu.memory_space<vmem>>, vector<16x32xf32>
      %c0_12 = arith.constant 0 : index
      %c0_13 = arith.constant 0 : index
      %13 = vector.load %arg4[%c0_12, %c0_13] : memref<1x32xf32, #tpu.memory_space<vmem>>, vector<1x32xf32>
      %14 = vector.broadcast %13 : vector<1x32xf32> to vector<16x32xf32>
      %15 = arith.addf %12, %14 : vector<16x32xf32>
      %c0_14 = arith.constant 0 : index
      %c0_15 = arith.constant 0 : index
      %16 = vector.load %arg5[%c0_14, %c0_15] : memref<16x32xf32, #tpu.memory_space<vmem>>, vector<16x32xf32>
      %17 = arith.addf %15, %16 : vector<16x32xf32>
      %cst_16 = arith.constant dense<0.000000e+00> : vector<16xf32>
      %18 = vector.multi_reduction <add>, %17, %cst_16 [1] : vector<16x32xf32> to vector<16xf32>
      %19 = vector.shape_cast %18 : vector<16xf32> to vector<16x1xf32>
      %cst_17 = arith.constant 3.200000e+01 : f32
      %20 = vector.broadcast %cst_17 : f32 to vector<16x1xf32>
      %21 = arith.divf %19, %20 : vector<16x1xf32>
      %22 = vector.broadcast %21 : vector<16x1xf32> to vector<16x32xf32>
      %23 = arith.subf %17, %22 : vector<16x32xf32>
      %24 = vector.broadcast %21 : vector<16x1xf32> to vector<16x32xf32>
      %25 = arith.subf %17, %24 : vector<16x32xf32>
      %26 = arith.mulf %23, %25 : vector<16x32xf32>
      %cst_18 = arith.constant dense<0.000000e+00> : vector<16xf32>
      %27 = vector.multi_reduction <add>, %26, %cst_18 [1] : vector<16x32xf32> to vector<16xf32>
      %28 = vector.shape_cast %27 : vector<16xf32> to vector<16x1xf32>
      %cst_19 = arith.constant 3.200000e+01 : f32
      %29 = vector.broadcast %cst_19 : f32 to vector<16x1xf32>
      %30 = arith.divf %28, %29 : vector<16x1xf32>
      %31 = vector.broadcast %21 : vector<16x1xf32> to vector<16x32xf32>
      %32 = arith.subf %17, %31 : vector<16x32xf32>
      %cst_20 = arith.constant 9.99999974E-6 : f32
      %33 = vector.broadcast %cst_20 : f32 to vector<16x1xf32>
      %34 = arith.addf %30, %33 : vector<16x1xf32>
      %35 = math.rsqrt %34 : vector<16x1xf32>
      %36 = vector.broadcast %35 : vector<16x1xf32> to vector<16x32xf32>
      %37 = arith.mulf %32, %36 : vector<16x32xf32>
      %c0_21 = arith.constant 0 : index
      %c0_22 = arith.constant 0 : index
      %38 = vector.load %arg6[%c0_21, %c0_22] : memref<1x32xf32, #tpu.memory_space<vmem>>, vector<1x32xf32>
      %39 = vector.broadcast %38 : vector<1x32xf32> to vector<16x32xf32>
      %40 = arith.mulf %37, %39 : vector<16x32xf32>
      %c0_23 = arith.constant 0 : index
      %c0_24 = arith.constant 0 : index
      %41 = vector.load %arg7[%c0_23, %c0_24] : memref<1x32xf32, #tpu.memory_space<vmem>>, vector<1x32xf32>
      %42 = vector.broadcast %41 : vector<1x32xf32> to vector<16x32xf32>
      %43 = arith.addf %40, %42 : vector<16x32xf32>
      %c0_25 = arith.constant 0 : index
      %c0_26 = arith.constant 0 : index
      %44 = vector.load %arg8[%c0_25, %c0_26] : memref<16x32xf32, #tpu.memory_space<vmem>>, vector<16x32xf32>
      tpu.vector_store %arg8[%c0_25, %c0_26], %43 {strides = array<i32>} : memref<16x32xf32, #tpu.memory_space<vmem>>, vector<16x32xf32>,
    } else {
    }
    return
  }
  func.func @transform_0(%arg0: i32, %arg1: i32) -> (i32, i32) {
    %c0_i32 = arith.constant 0 : i32
    return %arg0, %arg1 : i32, i32
  }
  func.func @transform_1(%arg0: i32, %arg1: i32) -> (i32, i32) {
    %c0_i32 = arith.constant 0 : i32
    %c0_i32_0 = arith.constant 0 : i32
    return %arg1, %c0_i32 : i32, i32
  }
  func.func @transform_2(%arg0: i32, %arg1: i32) -> (i32, i32) {
    %c0_i32 = arith.constant 0 : i32
    %c0_i32_0 = arith.constant 0 : i32
    %c0_i32_1 = arith.constant 0 : i32
    return %c0_i32, %c0_i32_0 : i32, i32
  }
  func.func @transform_3(%arg0: i32, %arg1: i32) -> (i32, i32) {
    %c0_i32 = arith.constant 0 : i32
    %c0_i32_0 = arith.constant 0 : i32
    return %arg0, %c0_i32 : i32, i32
  }
  func.func @transform_4(%arg0: i32, %arg1: i32) -> (i32, i32) {
    %c0_i32 = arith.constant 0 : i32
    %c0_i32_0 = arith.constant 0 : i32
    %c0_i32_1 = arith.constant 0 : i32
    return %c0_i32, %c0_i32_0 : i32, i32
  }
  func.func @transform_5(%arg0: i32, %arg1: i32) -> (i32, i32) {
    %c0_i32 = arith.constant 0 : i32
    %c0_i32_0 = arith.constant 0 : i32
    %c0_i32_1 = arith.constant 0 : i32
    return %c0_i32, %c0_i32_0 : i32, i32
  }
  func.func @transform_6(%arg0: i32, %arg1: i32) -> (i32, i32) {
    %c0_i32 = arith.constant 0 : i32
    %c0_i32_0 = arith.constant 0 : i32
    return %arg0, %c0_i32 : i32, i32
  }
}

module attributes {stable_mosaic.version = 11 : i64} {
  func.func @_attention_kernel(%arg0: i32, %arg1: memref<1x8x96xf32, #tpu.memory_space<vmem>>, %arg2: memref<1x1x1x8xf32, #tpu.memory_space<vmem>>, %arg3: memref<1x8x32xf32, #tpu.memory_space<vmem>>) attributes {dimension_semantics = [#tpu.dimension_semantics<parallel>], iteration_bounds = array<i64: 2>, scalar_prefetch = 0 : i64, scratch_operands = 0 : i64, tpu.core_type = #tpu.core_type<tc>, window_params = [{transform_indices = @transform_0, window_bounds = array<i64: 1, 8, 96>}, {transform_indices = @transform_1, window_bounds = array<i64: 1, 1, 1, 8>}, {transform_indices = @transform_2, window_bounds = array<i64: 1, 8, 32>}]} {
    %c0 = arith.constant 0 : index
    %c0_0 = arith.constant 0 : index
    %c0_1 = arith.constant 0 : index
    %0 = vector.load %arg1[%c0, %c0_0, %c0_1] : memref<1x8x96xf32, #tpu.memory_space<vmem>>, vector<1x8x96xf32>
    %1 = vector.shape_cast %0 : vector<1x8x96xf32> to vector<8x96xf32>
    %2 = vector.extract_strided_slice %1 {offsets = [0, 0], sizes = [8, 8], strides = [1, 1]} : vector<8x96xf32> to vector<8x8xf32>
    %3 = vector.extract_strided_slice %1 {offsets = [0, 8], sizes = [8, 8], strides = [1, 1]} : vector<8x96xf32> to vector<8x8xf32>
    %4 = vector.extract_strided_slice %1 {offsets = [0, 16], sizes = [8, 8], strides = [1, 1]} : vector<8x96xf32> to vector<8x8xf32>
    %5 = vector.extract_strided_slice %1 {offsets = [0, 24], sizes = [8, 8], strides = [1, 1]} : vector<8x96xf32> to vector<8x8xf32>
    %6 = vector.shape_cast %2 : vector<8x8xf32> to vector<1x8x8xf32>
    %7 = vector.shape_cast %3 : vector<8x8xf32> to vector<1x8x8xf32>
    %8 = vector.shape_cast %4 : vector<8x8xf32> to vector<1x8x8xf32>
    %9 = vector.shape_cast %5 : vector<8x8xf32> to vector<1x8x8xf32>
    %10 = tpu.concatenate %6, %7, %8, %9 in 0 : vector<1x8x8xf32>, vector<1x8x8xf32>, vector<1x8x8xf32>, vector<1x8x8xf32> -> vector<4x8x8xf32>
    %11 = vector.extract_strided_slice %1 {offsets = [0, 32], sizes = [8, 8], strides = [1, 1]} : vector<8x96xf32> to vector<8x8xf32>
    %12 = vector.extract_strided_slice %1 {offsets = [0, 40], sizes = [8, 8], strides = [1, 1]} : vector<8x96xf32> to vector<8x8xf32>
    %13 = vector.extract_strided_slice %1 {offsets = [0, 48], sizes = [8, 8], strides = [1, 1]} : vector<8x96xf32> to vector<8x8xf32>
    %14 = vector.extract_strided_slice %1 {offsets = [0, 56], sizes = [8, 8], strides = [1, 1]} : vector<8x96xf32> to vector<8x8xf32>
    %15 = vector.shape_cast %11 : vector<8x8xf32> to vector<1x8x8xf32>
    %16 = vector.shape_cast %12 : vector<8x8xf32> to vector<1x8x8xf32>
    %17 = vector.shape_cast %13 : vector<8x8xf32> to vector<1x8x8xf32>
    %18 = vector.shape_cast %14 : vector<8x8xf32> to vector<1x8x8xf32>
    %19 = tpu.concatenate %15, %16, %17, %18 in 0 : vector<1x8x8xf32>, vector<1x8x8xf32>, vector<1x8x8xf32>, vector<1x8x8xf32> -> vector<4x8x8xf32>
    %20 = vector.extract_strided_slice %1 {offsets = [0, 64], sizes = [8, 8], strides = [1, 1]} : vector<8x96xf32> to vector<8x8xf32>
    %21 = vector.extract_strided_slice %1 {offsets = [0, 72], sizes = [8, 8], strides = [1, 1]} : vector<8x96xf32> to vector<8x8xf32>
    %22 = vector.extract_strided_slice %1 {offsets = [0, 80], sizes = [8, 8], strides = [1, 1]} : vector<8x96xf32> to vector<8x8xf32>
    %23 = vector.extract_strided_slice %1 {offsets = [0, 88], sizes = [8, 8], strides = [1, 1]} : vector<8x96xf32> to vector<8x8xf32>
    %24 = vector.shape_cast %20 : vector<8x8xf32> to vector<1x8x8xf32>
    %25 = vector.shape_cast %21 : vector<8x8xf32> to vector<1x8x8xf32>
    %26 = vector.shape_cast %22 : vector<8x8xf32> to vector<1x8x8xf32>
    %27 = vector.shape_cast %23 : vector<8x8xf32> to vector<1x8x8xf32>
    %28 = tpu.concatenate %24, %25, %26, %27 in 0 : vector<1x8x8xf32>, vector<1x8x8xf32>, vector<1x8x8xf32>, vector<1x8x8xf32> -> vector<4x8x8xf32>
    %cst = arith.constant dense<0.000000e+00> : vector<4x8x8xf32>
    %29 = tpu.matmul %10, %19, %cst {dimension_numbers = #tpu.dot_dimension_numbers<[2], [2], [1], [1], [0, 0, 0, 1, 1, 1], [0], [0]>} : vector<4x8x8xf32>, vector<4x8x8xf32>, vector<4x8x8xf32> -> vector<4x8x8xf32>
    %cst_2 = arith.constant 0.353553385 : f32
    %30 = vector.broadcast %cst_2 : f32 to vector<4x8x8xf32>
    %31 = arith.mulf %29, %30 : vector<4x8x8xf32>
    %c0_3 = arith.constant 0 : index
    %c0_4 = arith.constant 0 : index
    %c0_5 = arith.constant 0 : index
    %c0_6 = arith.constant 0 : index
    %32 = vector.load %arg2[%c0_3, %c0_4, %c0_5, %c0_6] : memref<1x1x1x8xf32, #tpu.memory_space<vmem>>, vector<1x1x1x8xf32>
    %33 = vector.shape_cast %32 : vector<1x1x1x8xf32> to vector<1x8xf32>
    %cst_7 = arith.constant 0.000000e+00 : f32
    %34 = vector.broadcast %cst_7 : f32 to vector<1x8xf32>
    %35 = arith.cmpf oeq, %33, %34 : vector<1x8xf32>
    %36 = vector.shape_cast %35 : vector<1x8xi1> to vector<1x1x8xi1>
    %cst_8 = arith.constant -1.000000e+10 : f32
    %37 = vector.shape_cast %36 : vector<1x1x8xi1> to vector<1x1x8xi1>
    %38 = vector.broadcast %37 : vector<1x1x8xi1> to vector<4x8x8xi1>
    %39 = vector.broadcast %cst_8 : f32 to vector<4x8x8xf32>
    %40 = arith.select %38, %39, %31 : vector<4x8x8xi1>, vector<4x8x8xf32>
    %cst_9 = arith.constant dense<0xFF800000> : vector<4x8xf32>
    %41 = vector.multi_reduction <maximumf>, %40, %cst_9 [2] : vector<4x8x8xf32> to vector<4x8xf32>
    %42 = vector.shape_cast %41 : vector<4x8xf32> to vector<4x8x1xf32>
    %43 = vector.broadcast %42 : vector<4x8x1xf32> to vector<4x8x8xf32>
    %44 = arith.subf %40, %43 : vector<4x8x8xf32>
    %45 = math.exp %44 : vector<4x8x8xf32>
    %cst_10 = arith.constant dense<0.000000e+00> : vector<4x8xf32>
    %46 = vector.multi_reduction <add>, %45, %cst_10 [2] : vector<4x8x8xf32> to vector<4x8xf32>
    %47 = vector.shape_cast %46 : vector<4x8xf32> to vector<4x8x1xf32>
    %48 = tpu.reciprocal %47 {approx = true} : vector<4x8x1xf32> -> vector<4x8x1xf32>
    %49 = vector.broadcast %48 : vector<4x8x1xf32> to vector<4x8x8xf32>
    %50 = arith.mulf %45, %49 : vector<4x8x8xf32>
    %cst_11 = arith.constant dense<0.000000e+00> : vector<4x8x8xf32>
    %51 = tpu.matmul %50, %28, %cst_11 {dimension_numbers = #tpu.dot_dimension_numbers<[2], [1], [1], [2], [0, 0, 0, 1, 1, 2], [0], [0]>} : vector<4x8x8xf32>, vector<4x8x8xf32>, vector<4x8x8xf32> -> vector<4x8x8xf32>
    %52 = vector.extract_strided_slice %51 {offsets = [0, 0, 0], sizes = [1, 8, 8], strides = [1, 1, 1]} : vector<4x8x8xf32> to vector<1x8x8xf32>
    %53 = vector.shape_cast %52 : vector<1x8x8xf32> to vector<8x8xf32>
    %54 = vector.extract_strided_slice %51 {offsets = [1, 0, 0], sizes = [1, 8, 8], strides = [1, 1, 1]} : vector<4x8x8xf32> to vector<1x8x8xf32>
    %55 = vector.shape_cast %54 : vector<1x8x8xf32> to vector<8x8xf32>
    %56 = vector.extract_strided_slice %51 {offsets = [2, 0, 0], sizes = [1, 8, 8], strides = [1, 1, 1]} : vector<4x8x8xf32> to vector<1x8x8xf32>
    %57 = vector.shape_cast %56 : vector<1x8x8xf32> to vector<8x8xf32>
    %58 = vector.extract_strided_slice %51 {offsets = [3, 0, 0], sizes = [1, 8, 8], strides = [1, 1, 1]} : vector<4x8x8xf32> to vector<1x8x8xf32>
    %59 = vector.shape_cast %58 : vector<1x8x8xf32> to vector<8x8xf32>
    %60 = tpu.concatenate %53, %55, %57, %59 in 1 : vector<8x8xf32>, vector<8x8xf32>, vector<8x8xf32>, vector<8x8xf32> -> vector<8x32xf32>
    %c0_12 = arith.constant 0 : index
    %c0_13 = arith.constant 0 : index
    %c0_14 = arith.constant 0 : index
    %61 = vector.load %arg3[%c0_12, %c0_13, %c0_14] : memref<1x8x32xf32, #tpu.memory_space<vmem>>, vector<1x8x32xf32>
    %62 = vector.shape_cast %61 : vector<1x8x32xf32> to vector<8x32xf32>
    %63 = vector.shape_cast %60 : vector<8x32xf32> to vector<1x8x32xf32>
    tpu.vector_store %arg3[%c0_12, %c0_13, %c0_14], %63 {strides = array<i32>} : memref<1x8x32xf32, #tpu.memory_space<vmem>>, vector<1x8x32xf32>,
    return
  }
  func.func @transform_0(%arg0: i32) -> (i32, i32, i32) {
    %c0_i32 = arith.constant 0 : i32
    %c0_i32_0 = arith.constant 0 : i32
    %c0_i32_1 = arith.constant 0 : i32
    return %arg0, %c0_i32, %c0_i32_0 : i32, i32, i32
  }
  func.func @transform_1(%arg0: i32) -> (i32, i32, i32, i32) {
    %c0_i32 = arith.constant 0 : i32
    %c0_i32_0 = arith.constant 0 : i32
    %c0_i32_1 = arith.constant 0 : i32
    %c0_i32_2 = arith.constant 0 : i32
    return %arg0, %c0_i32, %c0_i32_0, %c0_i32_1 : i32, i32, i32, i32
  }
  func.func @transform_2(%arg0: i32) -> (i32, i32, i32) {
    %c0_i32 = arith.constant 0 : i32
    %c0_i32_0 = arith.constant 0 : i32
    %c0_i32_1 = arith.constant 0 : i32
    return %arg0, %c0_i32, %c0_i32_0 : i32, i32, i32
  }
}

module attributes {stable_mosaic.version = 11 : i64} {
  func.func @_ffn_res_ln_kernel(%arg0: i32, %arg1: i32, %arg2: memref<16x32xf32, #tpu.memory_space<vmem>>, %arg3: memref<32x64xf32, #tpu.memory_space<vmem>>, %arg4: memref<1x64xf32, #tpu.memory_space<vmem>>, %arg5: memref<64x32xf32, #tpu.memory_space<vmem>>, %arg6: memref<1x32xf32, #tpu.memory_space<vmem>>, %arg7: memref<1x32xf32, #tpu.memory_space<vmem>>, %arg8: memref<1x32xf32, #tpu.memory_space<vmem>>, %arg9: memref<16x32xf32, #tpu.memory_space<vmem>>, %arg10: memref<16x32xf32, #tpu.memory_space<vmem>>) attributes {dimension_semantics = [#tpu.dimension_semantics<parallel>, #tpu.dimension_semantics<arbitrary>], iteration_bounds = array<i64: 1, 1>, scalar_prefetch = 0 : i64, scratch_operands = 1 : i64, tpu.core_type = #tpu.core_type<tc>, window_params = [{transform_indices = @transform_0, window_bounds = array<i64: 16, 32>}, {transform_indices = @transform_1, window_bounds = array<i64: 32, 64>}, {transform_indices = @transform_2, window_bounds = array<i64: 1, 64>}, {transform_indices = @transform_3, window_bounds = array<i64: 64, 32>}, {pipeline_mode = #tpu.pipeline_mode<synchronous>, transform_indices = @transform_4, window_bounds = array<i64: 1, 32>}, {pipeline_mode = #tpu.pipeline_mode<synchronous>, transform_indices = @transform_5, window_bounds = array<i64: 1, 32>}, {pipeline_mode = #tpu.pipeline_mode<synchronous>, transform_indices = @transform_6, window_bounds = array<i64: 1, 32>}, {transform_indices = @transform_7, window_bounds = array<i64: 16, 32>}]} {
    %c0_i32 = arith.constant 0 : i32
    %0 = arith.cmpi eq, %arg1, %c0_i32 : i32
    %1 = arith.extui %0 : i1 to i32
    %c0_i32_0 = arith.constant 0 : i32
    %2 = arith.cmpi ne, %1, %c0_i32_0 : i32
    scf.if %2 {
      %cst_16 = arith.constant 0.000000e+00 : f32
      %19 = vector.broadcast %cst_16 : f32 to vector<16x32xf32>
      %c0_17 = arith.constant 0 : index
      %c0_18 = arith.constant 0 : index
      %20 = vector.load %arg10[%c0_17, %c0_18] : memref<16x32xf32, #tpu.memory_space<vmem>>, vector<16x32xf32>
      tpu.vector_store %arg10[%c0_17, %c0_18], %19 {strides = array<i32>} : memref<16x32xf32, #tpu.memory_space<vmem>>, vector<16x32xf32>,
    } else {
    }
    %c0 = arith.constant 0 : index
    %c0_1 = arith.constant 0 : index
    %3 = vector.load %arg2[%c0, %c0_1] : memref<16x32xf32, #tpu.memory_space<vmem>>, vector<16x32xf32>
    %c0_2 = arith.constant 0 : index
    %c0_3 = arith.constant 0 : index
    %4 = vector.load %arg3[%c0_2, %c0_3] : memref<32x64xf32, #tpu.memory_space<vmem>>, vector<32x64xf32>
    %cst = arith.constant dense<0.000000e+00> : vector<16x64xf32>
    %5 = tpu.matmul %3, %4, %cst {dimension_numbers = #tpu.dot_dimension_numbers<[1], [0], [0], [1], [0, 0, 1, 1], [], []>} : vector<16x32xf32>, vector<32x64xf32>, vector<16x64xf32> -> vector<16x64xf32>
    %c0_4 = arith.constant 0 : index
    %c0_5 = arith.constant 0 : index
    %6 = vector.load %arg4[%c0_4, %c0_5] : memref<1x64xf32, #tpu.memory_space<vmem>>, vector<1x64xf32>
    %7 = vector.broadcast %6 : vector<1x64xf32> to vector<16x64xf32>
    %8 = arith.addf %5, %7 : vector<16x64xf32>
    %cst_6 = arith.constant 0.000000e+00 : f32
    %9 = vector.broadcast %cst_6 : f32 to vector<16x64xf32>
    %10 = arith.maximumf %8, %9 : vector<16x64xf32>
    %c0_7 = arith.constant 0 : index
    %c0_8 = arith.constant 0 : index
    %11 = vector.load %arg10[%c0_7, %c0_8] : memref<16x32xf32, #tpu.memory_space<vmem>>, vector<16x32xf32>
    %c0_9 = arith.constant 0 : index
    %c0_10 = arith.constant 0 : index
    %12 = vector.load %arg5[%c0_9, %c0_10] : memref<64x32xf32, #tpu.memory_space<vmem>>, vector<64x32xf32>
    %cst_11 = arith.constant dense<0.000000e+00> : vector<16x32xf32>
    %13 = tpu.matmul %10, %12, %cst_11 {dimension_numbers = #tpu.dot_dimension_numbers<[1], [0], [0], [1], [0, 0, 1, 1], [], []>} : vector<16x64xf32>, vector<64x32xf32>, vector<16x32xf32> -> vector<16x32xf32>
    %14 = arith.addf %11, %13 : vector<16x32xf32>
    %c0_12 = arith.constant 0 : index
    %c0_13 = arith.constant 0 : index
    %15 = vector.load %arg10[%c0_12, %c0_13] : memref<16x32xf32, #tpu.memory_space<vmem>>, vector<16x32xf32>
    tpu.vector_store %arg10[%c0_12, %c0_13], %14 {strides = array<i32>} : memref<16x32xf32, #tpu.memory_space<vmem>>, vector<16x32xf32>,
    %c0_i32_14 = arith.constant 0 : i32
    %16 = arith.cmpi eq, %arg1, %c0_i32_14 : i32
    %17 = arith.extui %16 : i1 to i32
    %c0_i32_15 = arith.constant 0 : i32
    %18 = arith.cmpi ne, %17, %c0_i32_15 : i32
    scf.if %18 {
      %c0_16 = arith.constant 0 : index
      %c0_17 = arith.constant 0 : index
      %19 = vector.load %arg10[%c0_16, %c0_17] : memref<16x32xf32, #tpu.memory_space<vmem>>, vector<16x32xf32>
      %c0_18 = arith.constant 0 : index
      %c0_19 = arith.constant 0 : index
      %20 = vector.load %arg6[%c0_18, %c0_19] : memref<1x32xf32, #tpu.memory_space<vmem>>, vector<1x32xf32>
      %21 = vector.broadcast %20 : vector<1x32xf32> to vector<16x32xf32>
      %22 = arith.addf %19, %21 : vector<16x32xf32>
      %c0_20 = arith.constant 0 : index
      %c0_21 = arith.constant 0 : index
      %23 = vector.load %arg2[%c0_20, %c0_21] : memref<16x32xf32, #tpu.memory_space<vmem>>, vector<16x32xf32>
      %24 = arith.addf %22, %23 : vector<16x32xf32>
      %cst_22 = arith.constant dense<0.000000e+00> : vector<16xf32>
      %25 = vector.multi_reduction <add>, %24, %cst_22 [1] : vector<16x32xf32> to vector<16xf32>
      %26 = vector.shape_cast %25 : vector<16xf32> to vector<16x1xf32>
      %cst_23 = arith.constant 3.200000e+01 : f32
      %27 = vector.broadcast %cst_23 : f32 to vector<16x1xf32>
      %28 = arith.divf %26, %27 : vector<16x1xf32>
      %29 = vector.broadcast %28 : vector<16x1xf32> to vector<16x32xf32>
      %30 = arith.subf %24, %29 : vector<16x32xf32>
      %31 = vector.broadcast %28 : vector<16x1xf32> to vector<16x32xf32>
      %32 = arith.subf %24, %31 : vector<16x32xf32>
      %33 = arith.mulf %30, %32 : vector<16x32xf32>
      %cst_24 = arith.constant dense<0.000000e+00> : vector<16xf32>
      %34 = vector.multi_reduction <add>, %33, %cst_24 [1] : vector<16x32xf32> to vector<16xf32>
      %35 = vector.shape_cast %34 : vector<16xf32> to vector<16x1xf32>
      %cst_25 = arith.constant 3.200000e+01 : f32
      %36 = vector.broadcast %cst_25 : f32 to vector<16x1xf32>
      %37 = arith.divf %35, %36 : vector<16x1xf32>
      %38 = vector.broadcast %28 : vector<16x1xf32> to vector<16x32xf32>
      %39 = arith.subf %24, %38 : vector<16x32xf32>
      %cst_26 = arith.constant 9.99999974E-6 : f32
      %40 = vector.broadcast %cst_26 : f32 to vector<16x1xf32>
      %41 = arith.addf %37, %40 : vector<16x1xf32>
      %42 = math.rsqrt %41 : vector<16x1xf32>
      %43 = vector.broadcast %42 : vector<16x1xf32> to vector<16x32xf32>
      %44 = arith.mulf %39, %43 : vector<16x32xf32>
      %c0_27 = arith.constant 0 : index
      %c0_28 = arith.constant 0 : index
      %45 = vector.load %arg7[%c0_27, %c0_28] : memref<1x32xf32, #tpu.memory_space<vmem>>, vector<1x32xf32>
      %46 = vector.broadcast %45 : vector<1x32xf32> to vector<16x32xf32>
      %47 = arith.mulf %44, %46 : vector<16x32xf32>
      %c0_29 = arith.constant 0 : index
      %c0_30 = arith.constant 0 : index
      %48 = vector.load %arg8[%c0_29, %c0_30] : memref<1x32xf32, #tpu.memory_space<vmem>>, vector<1x32xf32>
      %49 = vector.broadcast %48 : vector<1x32xf32> to vector<16x32xf32>
      %50 = arith.addf %47, %49 : vector<16x32xf32>
      %c0_31 = arith.constant 0 : index
      %c0_32 = arith.constant 0 : index
      %51 = vector.load %arg9[%c0_31, %c0_32] : memref<16x32xf32, #tpu.memory_space<vmem>>, vector<16x32xf32>
      tpu.vector_store %arg9[%c0_31, %c0_32], %50 {strides = array<i32>} : memref<16x32xf32, #tpu.memory_space<vmem>>, vector<16x32xf32>,
    } else {
    }
    return
  }
  func.func @transform_0(%arg0: i32, %arg1: i32) -> (i32, i32) {
    %c0_i32 = arith.constant 0 : i32
    %c0_i32_0 = arith.constant 0 : i32
    return %arg0, %c0_i32 : i32, i32
  }
  func.func @transform_1(%arg0: i32, %arg1: i32) -> (i32, i32) {
    %c0_i32 = arith.constant 0 : i32
    %c0_i32_0 = arith.constant 0 : i32
    return %c0_i32, %arg1 : i32, i32
  }
  func.func @transform_2(%arg0: i32, %arg1: i32) -> (i32, i32) {
    %c0_i32 = arith.constant 0 : i32
    %c0_i32_0 = arith.constant 0 : i32
    return %c0_i32, %arg1 : i32, i32
  }
  func.func @transform_3(%arg0: i32, %arg1: i32) -> (i32, i32) {
    %c0_i32 = arith.constant 0 : i32
    %c0_i32_0 = arith.constant 0 : i32
    return %arg1, %c0_i32 : i32, i32
  }
  func.func @transform_4(%arg0: i32, %arg1: i32) -> (i32, i32) {
    %c0_i32 = arith.constant 0 : i32
    %c0_i32_0 = arith.constant 0 : i32
    %c0_i32_1 = arith.constant 0 : i32
    return %c0_i32, %c0_i32_0 : i32, i32
  }
  func.func @transform_5(%arg0: i32, %arg1: i32) -> (i32, i32) {
    %c0_i32 = arith.constant 0 : i32
    %c0_i32_0 = arith.constant 0 : i32
    %c0_i32_1 = arith.constant 0 : i32
    return %c0_i32, %c0_i32_0 : i32, i32
  }
  func.func @transform_6(%arg0: i32, %arg1: i32) -> (i32, i32) {
    %c0_i32 = arith.constant 0 : i32
    %c0_i32_0 = arith.constant 0 : i32
    %c0_i32_1 = arith.constant 0 : i32
    return %c0_i32, %c0_i32_0 : i32, i32
  }
  func.func @transform_7(%arg0: i32, %arg1: i32) -> (i32, i32) {
    %c0_i32 = arith.constant 0 : i32
    %c0_i32_0 = arith.constant 0 : i32
    return %arg0, %c0_i32 : i32, i32
  }
}

module attributes {stable_mosaic.version = 11 : i64} {
  func.func @_linear_kernel(%arg0: i32, %arg1: i32, %arg2: i32, %arg3: memref<16x32xf32, #tpu.memory_space<vmem>>, %arg4: memref<32x96xf32, #tpu.memory_space<vmem>>, %arg5: memref<1x96xf32, #tpu.memory_space<vmem>>, %arg6: memref<16x96xf32, #tpu.memory_space<vmem>>, %arg7: memref<16x96xf32, #tpu.memory_space<vmem>>) attributes {dimension_semantics = [#tpu.dimension_semantics<parallel>, #tpu.dimension_semantics<parallel>, #tpu.dimension_semantics<arbitrary>], iteration_bounds = array<i64: 1, 1, 1>, scalar_prefetch = 0 : i64, scratch_operands = 1 : i64, tpu.core_type = #tpu.core_type<tc>, window_params = [{transform_indices = @transform_0, window_bounds = array<i64: 16, 32>}, {transform_indices = @transform_1, window_bounds = array<i64: 32, 96>}, {transform_indices = @transform_2, window_bounds = array<i64: 1, 96>}, {transform_indices = @transform_3, window_bounds = array<i64: 16, 96>}]} {
    %c0_i32 = arith.constant 0 : i32
    %0 = arith.cmpi eq, %arg2, %c0_i32 : i32
    %1 = arith.extui %0 : i1 to i32
    %c0_i32_0 = arith.constant 0 : i32
    %2 = arith.cmpi ne, %1, %c0_i32_0 : i32
    scf.if %2 {
      %cst_10 = arith.constant 0.000000e+00 : f32
      %12 = vector.broadcast %cst_10 : f32 to vector<16x96xf32>
      %c0_11 = arith.constant 0 : index
      %c0_12 = arith.constant 0 : index
      %13 = vector.load %arg7[%c0_11, %c0_12] : memref<16x96xf32, #tpu.memory_space<vmem>>, vector<16x96xf32>
      tpu.vector_store %arg7[%c0_11, %c0_12], %12 {strides = array<i32>} : memref<16x96xf32, #tpu.memory_space<vmem>>, vector<16x96xf32>,
    } else {
    }
    %c0 = arith.constant 0 : index
    %c0_1 = arith.constant 0 : index
    %3 = vector.load %arg7[%c0, %c0_1] : memref<16x96xf32, #tpu.memory_space<vmem>>, vector<16x96xf32>
    %c0_2 = arith.constant 0 : index
    %c0_3 = arith.constant 0 : index
    %4 = vector.load %arg3[%c0_2, %c0_3] : memref<16x32xf32, #tpu.memory_space<vmem>>, vector<16x32xf32>
    %c0_4 = arith.constant 0 : index
    %c0_5 = arith.constant 0 : index
    %5 = vector.load %arg4[%c0_4, %c0_5] : memref<32x96xf32, #tpu.memory_space<vmem>>, vector<32x96xf32>
    %cst = arith.constant dense<0.000000e+00> : vector<16x96xf32>
    %6 = tpu.matmul %4, %5, %cst {dimension_numbers = #tpu.dot_dimension_numbers<[1], [0], [0], [1], [0, 0, 1, 1], [], []>} : vector<16x32xf32>, vector<32x96xf32>, vector<16x96xf32> -> vector<16x96xf32>
    %7 = arith.addf %3, %6 : vector<16x96xf32>
    %c0_6 = arith.constant 0 : index
    %c0_7 = arith.constant 0 : index
    %8 = vector.load %arg7[%c0_6, %c0_7] : memref<16x96xf32, #tpu.memory_space<vmem>>, vector<16x96xf32>
    tpu.vector_store %arg7[%c0_6, %c0_7], %7 {strides = array<i32>} : memref<16x96xf32, #tpu.memory_space<vmem>>, vector<16x96xf32>,
    %c0_i32_8 = arith.constant 0 : i32
    %9 = arith.cmpi eq, %arg2, %c0_i32_8 : i32
    %10 = arith.extui %9 : i1 to i32
    %c0_i32_9 = arith.constant 0 : i32
    %11 = arith.cmpi ne, %10, %c0_i32_9 : i32
    scf.if %11 {
      %c0_10 = arith.constant 0 : index
      %c0_11 = arith.constant 0 : index
      %12 = vector.load %arg7[%c0_10, %c0_11] : memref<16x96xf32, #tpu.memory_space<vmem>>, vector<16x96xf32>
      %c0_12 = arith.constant 0 : index
      %c0_13 = arith.constant 0 : index
      %13 = vector.load %arg5[%c0_12, %c0_13] : memref<1x96xf32, #tpu.memory_space<vmem>>, vector<1x96xf32>
      %14 = vector.broadcast %13 : vector<1x96xf32> to vector<16x96xf32>
      %15 = arith.addf %12, %14 : vector<16x96xf32>
      %c0_14 = arith.constant 0 : index
      %c0_15 = arith.constant 0 : index
      %16 = vector.load %arg6[%c0_14, %c0_15] : memref<16x96xf32, #tpu.memory_space<vmem>>, vector<16x96xf32>
      tpu.vector_store %arg6[%c0_14, %c0_15], %15 {strides = array<i32>} : memref<16x96xf32, #tpu.memory_space<vmem>>, vector<16x96xf32>,
    } else {
    }
    return
  }
  func.func @transform_0(%arg0: i32, %arg1: i32, %arg2: i32) -> (i32, i32) {
    %c0_i32 = arith.constant 0 : i32
    return %arg0, %arg2 : i32, i32
  }
  func.func @transform_1(%arg0: i32, %arg1: i32, %arg2: i32) -> (i32, i32) {
    %c0_i32 = arith.constant 0 : i32
    return %arg2, %arg1 : i32, i32
  }
  func.func @transform_2(%arg0: i32, %arg1: i32, %arg2: i32) -> (i32, i32) {
    %c0_i32 = arith.constant 0 : i32
    %c0_i32_0 = arith.constant 0 : i32
    return %c0_i32, %arg1 : i32, i32
  }
  func.func @transform_3(%arg0: i32, %arg1: i32, %arg2: i32) -> (i32, i32) {
    %c0_i32 = arith.constant 0 : i32
    return %arg0, %arg1 : i32, i32
  }
}

module attributes {stable_mosaic.version = 11 : i64} {
  func.func @_ffn_res_ln_kernel(%arg0: i32, %arg1: i32, %arg2: memref<16x32xf32, #tpu.memory_space<vmem>>, %arg3: memref<32x64xf32, #tpu.memory_space<vmem>>, %arg4: memref<1x64xf32, #tpu.memory_space<vmem>>, %arg5: memref<64x32xf32, #tpu.memory_space<vmem>>, %arg6: memref<1x32xf32, #tpu.memory_space<vmem>>, %arg7: memref<1x32xf32, #tpu.memory_space<vmem>>, %arg8: memref<1x32xf32, #tpu.memory_space<vmem>>, %arg9: memref<16x32xf32, #tpu.memory_space<vmem>>, %arg10: memref<16x32xf32, #tpu.memory_space<vmem>>) attributes {dimension_semantics = [#tpu.dimension_semantics<parallel>, #tpu.dimension_semantics<arbitrary>], iteration_bounds = array<i64: 1, 1>, scalar_prefetch = 0 : i64, scratch_operands = 1 : i64, tpu.core_type = #tpu.core_type<tc>, window_params = [{transform_indices = @transform_0, window_bounds = array<i64: 16, 32>}, {transform_indices = @transform_1, window_bounds = array<i64: 32, 64>}, {transform_indices = @transform_2, window_bounds = array<i64: 1, 64>}, {transform_indices = @transform_3, window_bounds = array<i64: 64, 32>}, {pipeline_mode = #tpu.pipeline_mode<synchronous>, transform_indices = @transform_4, window_bounds = array<i64: 1, 32>}, {pipeline_mode = #tpu.pipeline_mode<synchronous>, transform_indices = @transform_5, window_bounds = array<i64: 1, 32>}, {pipeline_mode = #tpu.pipeline_mode<synchronous>, transform_indices = @transform_6, window_bounds = array<i64: 1, 32>}, {transform_indices = @transform_7, window_bounds = array<i64: 16, 32>}]} {
    %c0_i32 = arith.constant 0 : i32
    %0 = arith.cmpi eq, %arg1, %c0_i32 : i32
    %1 = arith.extui %0 : i1 to i32
    %c0_i32_0 = arith.constant 0 : i32
    %2 = arith.cmpi ne, %1, %c0_i32_0 : i32
    scf.if %2 {
      %cst_16 = arith.constant 0.000000e+00 : f32
      %19 = vector.broadcast %cst_16 : f32 to vector<16x32xf32>
      %c0_17 = arith.constant 0 : index
      %c0_18 = arith.constant 0 : index
      %20 = vector.load %arg10[%c0_17, %c0_18] : memref<16x32xf32, #tpu.memory_space<vmem>>, vector<16x32xf32>
      tpu.vector_store %arg10[%c0_17, %c0_18], %19 {strides = array<i32>} : memref<16x32xf32, #tpu.memory_space<vmem>>, vector<16x32xf32>,
    } else {
    }
    %c0 = arith.constant 0 : index
    %c0_1 = arith.constant 0 : index
    %3 = vector.load %arg2[%c0, %c0_1] : memref<16x32xf32, #tpu.memory_space<vmem>>, vector<16x32xf32>
    %c0_2 = arith.constant 0 : index
    %c0_3 = arith.constant 0 : index
    %4 = vector.load %arg3[%c0_2, %c0_3] : memref<32x64xf32, #tpu.memory_space<vmem>>, vector<32x64xf32>
    %cst = arith.constant dense<0.000000e+00> : vector<16x64xf32>
    %5 = tpu.matmul %3, %4, %cst {dimension_numbers = #tpu.dot_dimension_numbers<[1], [0], [0], [1], [0, 0, 1, 1], [], []>} : vector<16x32xf32>, vector<32x64xf32>, vector<16x64xf32> -> vector<16x64xf32>
    %c0_4 = arith.constant 0 : index
    %c0_5 = arith.constant 0 : index
    %6 = vector.load %arg4[%c0_4, %c0_5] : memref<1x64xf32, #tpu.memory_space<vmem>>, vector<1x64xf32>
    %7 = vector.broadcast %6 : vector<1x64xf32> to vector<16x64xf32>
    %8 = arith.addf %5, %7 : vector<16x64xf32>
    %cst_6 = arith.constant 0.000000e+00 : f32
    %9 = vector.broadcast %cst_6 : f32 to vector<16x64xf32>
    %10 = arith.maximumf %8, %9 : vector<16x64xf32>
    %c0_7 = arith.constant 0 : index
    %c0_8 = arith.constant 0 : index
    %11 = vector.load %arg10[%c0_7, %c0_8] : memref<16x32xf32, #tpu.memory_space<vmem>>, vector<16x32xf32>
    %c0_9 = arith.constant 0 : index
    %c0_10 = arith.constant 0 : index
    %12 = vector.load %arg5[%c0_9, %c0_10] : memref<64x32xf32, #tpu.memory_space<vmem>>, vector<64x32xf32>
    %cst_11 = arith.constant dense<0.000000e+00> : vector<16x32xf32>
    %13 = tpu.matmul %10, %12, %cst_11 {dimension_numbers = #tpu.dot_dimension_numbers<[1], [0], [0], [1], [0, 0, 1, 1], [], []>} : vector<16x64xf32>, vector<64x32xf32>, vector<16x32xf32> -> vector<16x32xf32>
    %14 = arith.addf %11, %13 : vector<16x32xf32>
    %c0_12 = arith.constant 0 : index
    %c0_13 = arith.constant 0 : index
    %15 = vector.load %arg10[%c0_12, %c0_13] : memref<16x32xf32, #tpu.memory_space<vmem>>, vector<16x32xf32>
    tpu.vector_store %arg10[%c0_12, %c0_13], %14 {strides = array<i32>} : memref<16x32xf32, #tpu.memory_space<vmem>>, vector<16x32xf32>,
    %c0_i32_14 = arith.constant 0 : i32
    %16 = arith.cmpi eq, %arg1, %c0_i32_14 : i32
    %17 = arith.extui %16 : i1 to i32
    %c0_i32_15 = arith.constant 0 : i32
    %18 = arith.cmpi ne, %17, %c0_i32_15 : i32
    scf.if %18 {
      %c0_16 = arith.constant 0 : index
      %c0_17 = arith.constant 0 : index
      %19 = vector.load %arg10[%c0_16, %c0_17] : memref<16x32xf32, #tpu.memory_space<vmem>>, vector<16x32xf32>
      %c0_18 = arith.constant 0 : index
      %c0_19 = arith.constant 0 : index
      %20 = vector.load %arg6[%c0_18, %c0_19] : memref<1x32xf32, #tpu.memory_space<vmem>>, vector<1x32xf32>
      %21 = vector.broadcast %20 : vector<1x32xf32> to vector<16x32xf32>
      %22 = arith.addf %19, %21 : vector<16x32xf32>
      %c0_20 = arith.constant 0 : index
      %c0_21 = arith.constant 0 : index
      %23 = vector.load %arg2[%c0_20, %c0_21] : memref<16x32xf32, #tpu.memory_space<vmem>>, vector<16x32xf32>
      %24 = arith.addf %22, %23 : vector<16x32xf32>
      %cst_22 = arith.constant dense<0.000000e+00> : vector<16xf32>
      %25 = vector.multi_reduction <add>, %24, %cst_22 [1] : vector<16x32xf32> to vector<16xf32>
      %26 = vector.shape_cast %25 : vector<16xf32> to vector<16x1xf32>
      %cst_23 = arith.constant 3.200000e+01 : f32
      %27 = vector.broadcast %cst_23 : f32 to vector<16x1xf32>
      %28 = arith.divf %26, %27 : vector<16x1xf32>
      %29 = vector.broadcast %28 : vector<16x1xf32> to vector<16x32xf32>
      %30 = arith.subf %24, %29 : vector<16x32xf32>
      %31 = vector.broadcast %28 : vector<16x1xf32> to vector<16x32xf32>
      %32 = arith.subf %24, %31 : vector<16x32xf32>
      %33 = arith.mulf %30, %32 : vector<16x32xf32>
      %cst_24 = arith.constant dense<0.000000e+00> : vector<16xf32>
      %34 = vector.multi_reduction <add>, %33, %cst_24 [1] : vector<16x32xf32> to vector<16xf32>
      %35 = vector.shape_cast %34 : vector<16xf32> to vector<16x1xf32>
      %cst_25 = arith.constant 3.200000e+01 : f32
      %36 = vector.broadcast %cst_25 : f32 to vector<16x1xf32>
      %37 = arith.divf %35, %36 : vector<16x1xf32>
      %38 = vector.broadcast %28 : vector<16x1xf32> to vector<16x32xf32>
      %39 = arith.subf %24, %38 : vector<16x32xf32>
      %cst_26 = arith.constant 9.99999974E-6 : f32
      %40 = vector.broadcast %cst_26 : f32 to vector<16x1xf32>
      %41 = arith.addf %37, %40 : vector<16x1xf32>
      %42 = math.rsqrt %41 : vector<16x1xf32>
      %43 = vector.broadcast %42 : vector<16x1xf32> to vector<16x32xf32>
      %44 = arith.mulf %39, %43 : vector<16x32xf32>
      %c0_27 = arith.constant 0 : index
      %c0_28 = arith.constant 0 : index
      %45 = vector.load %arg7[%c0_27, %c0_28] : memref<1x32xf32, #tpu.memory_space<vmem>>, vector<1x32xf32>
      %46 = vector.broadcast %45 : vector<1x32xf32> to vector<16x32xf32>
      %47 = arith.mulf %44, %46 : vector<16x32xf32>
      %c0_29 = arith.constant 0 : index
      %c0_30 = arith.constant 0 : index
      %48 = vector.load %arg8[%c0_29, %c0_30] : memref<1x32xf32, #tpu.memory_space<vmem>>, vector<1x32xf32>
      %49 = vector.broadcast %48 : vector<1x32xf32> to vector<16x32xf32>
      %50 = arith.addf %47, %49 : vector<16x32xf32>
      %c0_31 = arith.constant 0 : index
      %c0_32 = arith.constant 0 : index
      %51 = vector.load %arg9[%c0_31, %c0_32] : memref<16x32xf32, #tpu.memory_space<vmem>>, vector<16x32xf32>
      tpu.vector_store %arg9[%c0_31, %c0_32], %50 {strides = array<i32>} : memref<16x32xf32, #tpu.memory_space<vmem>>, vector<16x32xf32>,
    } else {
    }
    return
  }
  func.func @transform_0(%arg0: i32, %arg1: i32) -> (i32, i32) {
    %c0_i32 = arith.constant 0 : i32
    %c0_i32_0 = arith.constant 0 : i32
    return %arg0, %c0_i32 : i32, i32
  }
  func.func @transform_1(%arg0: i32, %arg1: i32) -> (i32, i32) {
    %c0_i32 = arith.constant 0 : i32
    %c0_i32_0 = arith.constant 0 : i32
    return %c0_i32, %arg1 : i32, i32
  }
  func.func @transform_2(%arg0: i32, %arg1: i32) -> (i32, i32) {
    %c0_i32 = arith.constant 0 : i32
    %c0_i32_0 = arith.constant 0 : i32
    return %c0_i32, %arg1 : i32, i32
  }
  func.func @transform_3(%arg0: i32, %arg1: i32) -> (i32, i32) {
    %c0_i32 = arith.constant 0 : i32
    %c0_i32_0 = arith.constant 0 : i32
    return %arg1, %c0_i32 : i32, i32
  }
  func.func @transform_4(%arg0: i32, %arg1: i32) -> (i32, i32) {
    %c0_i32 = arith.constant 0 : i32
    %c0_i32_0 = arith.constant 0 : i32
    %c0_i32_1 = arith.constant 0 : i32
    return %c0_i32, %c0_i32_0 : i32, i32
  }
  func.func @transform_5(%arg0: i32, %arg1: i32) -> (i32, i32) {
    %c0_i32 = arith.constant 0 : i32
    %c0_i32_0 = arith.constant 0 : i32
    %c0_i32_1 = arith.constant 0 : i32
    return %c0_i32, %c0_i32_0 : i32, i32
  }
  func.func @transform_6(%arg0: i32, %arg1: i32) -> (i32, i32) {
    %c0_i32 = arith.constant 0 : i32
    %c0_i32_0 = arith.constant 0 : i32
    %c0_i32_1 = arith.constant 0 : i32
    return %c0_i32, %c0_i32_0 : i32, i32
  }
  func.func @transform_7(%arg0: i32, %arg1: i32) -> (i32, i32) {
    %c0_i32 = arith.constant 0 : i32
    %c0_i32_0 = arith.constant 0 : i32
    return %arg0, %c0_i32 : i32, i32
  }
}

</mosaic_0001>

<bundles_post_ra>
// kernel: encoder_forward.8
= control target key start
LH: loop header
LB: loop body
LE: loop exit
PB: predicated region body
PF: predicated region fallthrough
CT: control target
= control target key end

     0   :  { %s493_s18 = smov 0   ;;  %s531_s0 = inlined_call_operand.vmem [shape: f32[2,8,32], index: 0, kind: input, shape index: {}]   ;;  %s532_s1 = inlined_call_operand.vmem [shape: f32[8,32], index: 1, kind: input, shape index: {}]   ;;  %s533_s2 = inlined_call_operand.vmem [shape: f32[32,96], index: 2, kind: input, shape index: {}]   ;;  %s534_s3 = inlined_call_operand.vmem [shape: f32[1,96], index: 3, kind: input, shape index: {}]   ;;  %s535_s4 = inlined_call_operand.vmem [shape: f32[2,8,96], index: 4, kind: output, shape index: {0}]   ;;  %s536_s5 = inlined_call_operand.vmem [shape: f32[2,8,32], index: 5, kind: output, shape index: {1}]  }
   0x1 LB: > { %s407_s19 = sadd.s32 4294967295, %s458_s18   ;;  %p411_p0 = scmp.ge.s32.totalorder %s458_s18, 1  ;;  %s458_s18 = sphi %s493_s18, %s16_s18  }
   0x2   : > { %p189_p1 = scmp.lt.s32.totalorder %s458_s18, 3 }
   0x4   : > { %p190_p2 = pnand %p411_p0, %p189_p1 }
   0x5   : > { %v237_v0 = vld [vmem:[%s533_s2] sm:$0xff] (!%p190_p2)  ;;  %v238_v1 = vld [vmem:[%s533_s2 + $0x8] sm:$0xff] (!%p190_p2)  ;;  %v239_v2 = vld [vmem:[%s533_s2 + $0x10] sm:$0xff] (!%p190_p2)  ;;  %v460_v3 = vmov (!%p190_p2), 0.0|0.0   ;;  %vm461_vm0 = vmmov (!%p190_p2), 0   ;;  %v462_v6 = vmov (!%p190_p2), 0.0  }
   0x6   : > { %193 = sbr.rel (%p190_p2) target bundleno = 236 (0xec), region = 36  ;;  %435 = vmatprep.subr.bf16.mxu0 (!%p190_p2), %v460_v3  ;;  %v436_v4 = vpack.c.bf16 (!%p190_p2), %v238_v1, %v237_v0  ;;  %v240_v5 = vld [vmem:[%s533_s2 + $0x18] sm:$0xff] (!%p190_p2)  ;;  %432 = vmatprep.mubr.msk.f32.mxu0 (!%p190_p2), %vm461_vm0, %v462_v6  ;;  %p219_p3 = scmp.lt.s32.totalorder (!%p190_p2), %s407_s19, 1  ;;  %v233_v9 = vld [vmem:[%s532_s1] sm:$0xff] (!%p190_p2)  ;;  %vm235_vm1 = vcmask (!%p190_p2), 261120   ;;  %vm321_vm2 = vcmask (!%p190_p2), 785408  }
   0x7   : > { %v439_v7 = vpack.c.bf16 (!%p190_p2), %v240_v5, %v239_v2  ;;  %v415_v12 = vld [vmem:[%s534_s3] ss:$0 sm:$0xff] (!%p190_p2) }
   0x8   : > { %437 = vmatpush3.bf16.msra.mxu0 (!%p190_p2), %v436_v4 }
   0x9   : > { %438 = vmatprep.subr.bf16.mxu0 (!%p190_p2), %v460_v3 }
   0xc   : > { %440 = vmatpush3.bf16.msra.mxu0 (!%p190_p2), %v439_v7 }
   0xd   : > { %s538_s19 = smov (!%p219_p3, %s407_s19), 1 }
   0xe   : > { %s412_s28 = sshll.u32 %s538_s19, 3 }
   0xf   : > { %s222_s6 = scalar_lea.vmem %s531_s0, %s412_s28  ;;  %s230_s11 = scalar_lea.vmem %s536_s5, %s412_s28 }
  0x10   : > { %v231_v8 = vld [vmem:[%s222_s6] sm:$0xff]  ;;  %s226_s16 = scalar_lea.vmem %s535_s4, %s412_s28 }
  0x11   : > { %v232_v10 = vmul.f32 5.656854, %v231_v8 }
  0x13   : > { %v234_v11 = vadd.f32 %v233_v9, %v232_v10 }
  0x15   : > { %236 = vst.msk [vmem:[%s230_s11] sm:$0xff] %vm235_vm1, %v234_v11  ;;  %433 = vmatmul.mubr.msk.f32.vlgmr.msra.gmra.mrb[0].mxu0 %vm235_vm1, %v234_v11 }
  0xe8   : > { %v317_v13 = vpop.f32.mrb[0].mxu0 }
  0xe9   : > { %v318_v14 = vadd.f32 %v415_v12, %v317_v13  ;;  %v434_v15 = vpop.f32.mrb[1].mxu0 }
  0xeb   : > { %322 = vst.msk [vmem:[%s226_s16] sm:$0xff] %vm321_vm2, %v318_v14 }
  0xec PF: > { %s16_s18 = sadd.s32 1, %s458_s18  }
  0xed   : > { %p13_p4 = scmp.ge.s32.totalorder %s16_s18, 4  }
  0xef   :  { %15 = sbr.rel (!%p13_p4) target bundleno = 1 (0x1), region = 78 }

// kernel: encoder_forward.10
= control target key start
LH: loop header
LB: loop body
LE: loop exit
PB: predicated region body
PF: predicated region fallthrough
CT: control target
= control target key end

     0   :  { %vm27_vm0 = vcmask 261120   ;;  %v228_v3 = vmov 0.0   ;;  %s315_s1 = inlined_call_operand.vmem [shape: f32[32,32], index: 1, kind: input, shape index: {}]   ;;  %s316_s0 = inlined_call_operand.vmem [shape: f32[16,32], index: 0, kind: input, shape index: {}]   ;;  %s317_s2 = inlined_call_operand.vmem [shape: f32[1,32], index: 2, kind: input, shape index: {}]   ;;  %s318_s3 = inlined_call_operand.vmem [shape: f32[16,32], index: 3, kind: input, shape index: {}]   ;;  %s319_s4 = inlined_call_operand.vmem [shape: f32[1,32], index: 4, kind: input, shape index: {}]   ;;  %s320_s5 = inlined_call_operand.vmem [shape: f32[1,32], index: 5, kind: input, shape index: {}]   ;;  %s321_s6 = inlined_call_operand.vmem [shape: f32[16,32], index: 6, kind: output, shape index: {}]  }
   0x1   :  { %v34_v0 = vld [vmem:[%s315_s1] sm:$0xff]  ;;  %v35_v1 = vld [vmem:[%s315_s1 + $0x8] sm:$0xff]  ;;  %v36_v2 = vld [vmem:[%s315_s1 + $0x10] sm:$0xff]  ;;  %29 = vst.msk [vmem:[#allocation2 + $0x8] sm:$0xff] %vm27_vm0, %v228_v3 }
   0x2   :  { %28 = vst.msk [vmem:[#allocation2] sm:$0xff] %vm27_vm0, %v228_v3  ;;  %v215_v4 = vpack.c.bf16 %v35_v1, %v34_v0  ;;  %v37_v5 = vld [vmem:[%s315_s1 + $0x18] sm:$0xff]  ;;  %v32_v6 = vld [vmem:[%s316_s0] sm:$0xff]  ;;  %v33_v8 = vld [vmem:[%s316_s0 + $0x8] sm:$0xff] }
   0x3   :  { %v219_v7 = vpack.c.bf16 %v37_v5, %v36_v2  ;;  %212 = vmatprep.mubr.msk.f32.mxu0 %vm27_vm0, %v32_v6  ;;  %v195_v15 = vld [vmem:[%s317_s2] ss:$0 sm:$0xff]  ;;  %v139_v21 = vld [vmem:[%s318_s3 + $0x8] sm:$0xff] }
   0x4   :  { %216 = vmatprep.subr.bf16.mxu0 %v215_v4  ;;  %v138_v18 = vld [vmem:[%s318_s3] sm:$0xff] }
   0x5   :  { %218 = vmatpush3.bf16.msra.mxu0 %v215_v4  ;;  %v196_v43 = vld [vmem:[%s319_s4] ss:$0 sm:$0xff] }
   0x6   :  { %220 = vmatprep.subr.bf16.mxu0 %v219_v7  ;;  %v197_v45 = vld [vmem:[%s320_s5] ss:$0 sm:$0xff] }
   0x8   :  { %v31_v9 = vld [vmem:[#allocation2 + $0x8] sm:$0xff] }
   0x9   :  { %222 = vmatpush3.bf16.msra.mxu0 %v219_v7  ;;  %v30_v10 = vld [vmem:[#allocation2] sm:$0xff] }
   0xc   :  { %213 = vmatmul.mubr.msk.f32.vlgmr.msra.gmra.mrb[0].mxu0 %vm27_vm0, %v33_v8 }
  0xdf   :  { %v214_v11 = vpop.f32.mrb[0].mxu0 }
  0xe0   :  { %v121_v12 = vadd.f32 %v214_v11, %v31_v9  ;;  %v111_v13 = vpop.f32.mrb[1].mxu0 }
  0xe1   :  { %v120_v14 = vadd.f32 %v111_v13, %v30_v10 }
  0xe2   :  { %123 = vst.msk [vmem:[#allocation2 + $0x8] sm:$0xff] %vm27_vm0, %v121_v12 }
  0xe3   :  { %122 = vst.msk [vmem:[#allocation2] sm:$0xff] %vm27_vm0, %v120_v14 }
  0xe9   :  { %v128_v16 = vld [vmem:[#allocation2 + $0x8] sm:$0xff] }
  0xea   :  { %v127_v17 = vld [vmem:[#allocation2] sm:$0xff]  ;;  %v137_v20 = vadd.f32 %v195_v15, %v128_v16 }
  0xeb   :  { %v136_v19 = vadd.f32 %v195_v15, %v127_v17 }
  0xec   :  { %v141_v24 = vadd.f32 %v139_v21, %v137_v20 }
  0xed   :  { %v140_v22 = vadd.f32 %v138_v18, %v136_v19 }
  0xee   :  { %v145_v25 = vsel %vm27_vm0, %v141_v24, 0.0 }
  0xef   :  { %v142_v23 = vsel %vm27_vm0, %v140_v22, 0.0 }
  0xf0   :  { %143 = vadd.xlane.f32.xlu0 %v142_v23 }
  0xf4   :  { %146 = vadd.xlane.f32.xlu0 %v145_v25 }
 0x17d   :  { %v144_v26 = vpop.xlane.xlu0 %143 }
 0x17e   :  { %v149_v27 = vmul.f32 0.03125, %v144_v26 }
 0x180   :  { %v151_v28 = vsub.f32 %v140_v22, %v149_v27 }
 0x181   :  { %v147_v29 = vpop.xlane.xlu0 %146 }
 0x182   :  { %v150_v30 = vmul.f32 0.03125, %v147_v29  ;;  %v153_v31 = vmul.f32 %v151_v28, %v151_v28 }
 0x184   :  { %v152_v32 = vsub.f32 %v141_v24, %v150_v30  ;;  %v155_v33 = vsel %vm27_vm0, %v153_v31, 0.0 }
 0x185   :  { %156 = vadd.xlane.f32.xlu1 %v155_v33 }
 0x186   :  { %v154_v34 = vmul.f32 %v152_v32, %v152_v32 }
 0x188   :  { %v158_v35 = vsel %vm27_vm0, %v154_v34, 0.0 }
 0x189   :  { %159 = vadd.xlane.f32.xlu1 %v158_v35 }
 0x212   :  { %v157_v36 = vpop.xlane.xlu1 %156 }
 0x213   :  { %v161_v37 = vmul.f32 0.03125, %v157_v36 }
 0x215   :  { %v163_v38 = vadd.f32 1e-05, %v161_v37 }
 0x216   :  { %v160_v39 = vpop.xlane.xlu1 %159 }
 0x217   :  { %224 = vrsqrt.f32 %v163_v38  ;;  %v162_v40 = vmul.f32 0.03125, %v160_v39 }
 0x219   :  { %v164_v41 = vadd.f32 1e-05, %v162_v40 }
 0x21b   :  { %226 = vrsqrt.f32 %v164_v41 }
 0x221   :  { %v225_v42 = vpop.eup %224 }
 0x222   :  { %v167_v44 = vmul.f32 %v225_v42, %v151_v28 }
 0x224   :  { %v176_v46 = vmul.f32 %v196_v43, %v167_v44 }
 0x225   :  { %v227_v47 = vpop.eup %226 }
 0x226   :  { %v185_v48 = vadd.f32 %v197_v45, %v176_v46  ;;  %v168_v49 = vmul.f32 %v227_v47, %v152_v32 }
 0x228   :  { %187 = vst.msk [vmem:[%s321_s6] sm:$0xff] %vm27_vm0, %v185_v48  ;;  %v177_v50 = vmul.f32 %v196_v43, %v168_v49 }
 0x22a   :  { %v186_v51 = vadd.f32 %v197_v45, %v177_v50 }
 0x22c   :  { %188 = vst.msk [vmem:[%s321_s6 + $0x8] sm:$0xff] %vm27_vm0, %v186_v51 }

// kernel: encoder_forward.9
= control target key start
LH: loop header
LB: loop body
LE: loop exit
PB: predicated region body
PF: predicated region fallthrough
CT: control target
= control target key end

     0   :  { %s1057_s9 = smov 0   ;;  %s1156_s0 = inlined_call_operand.vmem [shape: f32[2,8,96], index: 0, kind: input, shape index: {}]   ;;  %s1157_s1 = inlined_call_operand.vmem [shape: f32[2,1,1,8], index: 1, kind: input, shape index: {}]   ;;  %s1158_s2 = inlined_call_operand.vmem [shape: f32[2,8,32], index: 2, kind: output, shape index: {}]  }
   0x1 LB: > { %s911_s10 = sadd.s32 4294967295, %s1029_s9   ;;  %p915_p0 = scmp.ge.s32.totalorder %s1029_s9, 1  ;;  %s1029_s9 = sphi %s1057_s9, %s12_s9  }
   0x2   : > { %p119_p1 = scmp.lt.s32.totalorder %s1029_s9, 3 }
   0x4   : > { %p120_p2 = pnand %p915_p0, %p119_p1 }
   0x5   : > { %p142_p3 = scmp.lt.s32.totalorder (!%p120_p2), %s911_s10, 1  ;;  %v1031_v0 = vmov (!%p120_p2), 0.0   ;;  %vm1032_vm0 = vmmov (!%p120_p2), 0   ;;  %s1033_s15 = smov (!%p120_p2), 104   ;;  %vm163_vm1 = vcmask (!%p120_p2), 64512   ;;  %v473_v9 = vlaneseq (!%p120_p2) }
   0x6   : > { %123 = sbr.rel (%p120_p2) target bundleno = 1114 (0x45a), region = 28  ;;  %948 = vmatprep.subr.mxu0 (!%p120_p2), %v1031_v0  ;;  %950 = vmatprep.mubr.msk.f32.mxu0 (!%p120_p2), %vm1032_vm0, %v1031_v0  ;;  %s1034_s16 = smov (!%p120_p2), 120   ;;  %v1037_v13 = vmov (!%p120_p2), 0   ;;  %vm843_vm4 = vcmask (!%p120_p2), 130048   ;;  %vm845_vm5 = vcmask (!%p120_p2), 195584   ;;  %vm847_vm6 = vcmask (!%p120_p2), 261120  }
   0x7   : > { %953 = vmatprep.subr.mxu1 (!%p120_p2), %v1031_v0  ;;  %955 = vmatprep.mubr.msk.f32.mxu1 (!%p120_p2), %vm1032_vm0, %v1031_v0  ;;  %s1035_s17 = smov (!%p120_p2), 96   ;;  %s1036_s18 = smov (!%p120_p2), 112   ;;  %v474_v11 = vshrl.u32 (!%p120_p2), %v473_v9, 7 }
   0x8   : > { %s1038_s22 = smov (!%p120_p2), 64   ;;  %s1039_s23 = smov (!%p120_p2), 8  }
   0x9   : > { %v475_v12 = vsub.s32 (!%p120_p2), 0, %v474_v11  ;;  %s1040_s24 = smov (!%p120_p2), 24   ;;  %s1041_s25 = smov (!%p120_p2), 16  }
   0xd   : > { %s1160_s10 = smov (!%p142_p3, %s911_s10), 1 }
   0xe   : > { %s916_s11 = sshll.u32 %s1160_s10, 3  ;;  %s148_s21 = scalar_lea.vmem %s1157_s1, %s1160_s10 }
   0xf   : > { %s145_s14 = scalar_lea.vmem %s1156_s0, %s916_s11  ;;  %v470_v10 = vld [vmem:[%s148_s21] sm:$0x1]  ;;  %s152_s28 = scalar_lea.vmem %s1158_s2, %s916_s11 }
  0x10   : > { %v1079_v1 = vld [vmem:[%s145_s14] sm:$0xff]  ;;  %vm471_vm2 = vcmp.eq.f32.partialorder %v470_v10, 0.0 }
  0x11   : > { %159 = vrot.lane.b32.xlu1 %v1079_v1, %s1033_s15  ;;  %155 = vrot.lane.b32.xlu0 %v1079_v1, %s1034_s16  ;;  %v472_v14 = vsel %vm471_vm2, 1, %v1037_v13 }
  0x12   : > { %v476_v15 = vrot.slane %v472_v14, %v475_v12 }
  0x14   : > { %vm477_vm3 = vcmp.eq.s32.totalorder %v476_v15, 1 }
  0x15   : > { %161 = vrot.lane.b32.xlu1 %v1079_v1, %s1035_s17  ;;  %157 = vrot.lane.b32.xlu0 %v1079_v1, %s1036_s18 }
  0x83   : > { %v1085_v2 = vpop.permute.xlu1 %159  ;;  %v156_v3 = vpop.permute.xlu0 %155 }
  0x84   : > { %238 = vrot.lane.b32.xlu0 %v156_v3, %s1035_s17 }
  0x87   : > { %v162_v4 = vpop.permute.xlu1 %161  ;;  %v1087_v5 = vpop.permute.xlu0 %157 }
  0x88   : > { %949 = vmatpush3.xpose.msk.msra.mxu0 %vm163_vm1, %v162_v4  ;;  %390 = vrot.lane.b32.xlu0 %v1085_v2, %s1035_s17 }
  0x89   : > { %314 = vrot.lane.b32.xlu1 %v1087_v5, %s1035_s17  ;;  %958 = vmatprep.subr.mxu0 %v1031_v0 }
  0x8b   : > { %951 = vmatmul.mubr.msk.f32.vlgmr.msra.gmra.mrb[0].mxu0 %vm163_vm1, %v1079_v1 }
  0x8c   : > { %960 = vmatprep.mubr.msk.f32.mxu0 %vm1032_vm0, %v1031_v0 }
  0xf6   : > { %v239_v6 = vpop.permute.xlu0 %238 }
  0xf7   : > { %954 = vmatpush3.xpose.msk.msra.mxu1 %vm163_vm1, %v239_v6 }
  0xf8   : > { %963 = vmatprep.subr.mxu1 %v1031_v0 }
  0xfa   : > { %956 = vmatmul.mubr.msk.f32.vlgmr.msra.gmra.mrb[0].mxu1 %vm163_vm1, %v156_v3  ;;  %v391_v7 = vpop.permute.xlu0 %390 }
  0xfb   : > { %v315_v8 = vpop.permute.xlu1 %314  ;;  %964 = vmatpush3.xpose.msk.msra.mxu1 %vm163_vm1, %v391_v7  ;;  %965 = vmatprep.mubr.msk.f32.mxu1 %vm1032_vm0, %v1031_v0 }
  0xfc   : > { %959 = vmatpush3.xpose.msk.msra.mxu0 %vm163_vm1, %v315_v8  ;;  %973 = vmatprep.subr.mxu1 %v1031_v0 }
  0xfd   : > { %968 = vmatprep.subr.mxu0 %v1031_v0 }
  0xfe   : > { %966 = vmatmul.mubr.msk.f32.vlgmr.msra.gmra.mrb[2].mxu1 %vm163_vm1, %v1085_v2 }
  0xff   : > { %961 = vmatmul.mubr.msk.f32.vlgmr.msra.gmra.mrb[2].mxu0 %vm163_vm1, %v1087_v5  ;;  %975 = vmatprep.mubr.msk.f32.mxu1 %vm1032_vm0, %v1031_v0 }
 0x100   : > { %970 = vmatprep.mubr.msk.f32.mxu0 %vm1032_vm0, %v1031_v0 }
 0x15e   : > { %v234_v16 = vpop.f32.mrb[0].mxu0 }
 0x15f   : > { %v466_v17 = vmul.f32 0.35355338, %v234_v16  ;;  %v952_v18 = vpop.f32.mrb[1].mxu0 }
 0x161   : > { %v478_v19 = vsel %vm477_vm3, -1e+10, %v466_v17 }
 0x162   : > { %v482_v20 = vsel %vm163_vm1, %v478_v19, -inf }
 0x163   : > { %483 = vmax.xlane.f32.xlu1 %v482_v20 }
 0x1cd   : > { %v310_v21 = vpop.f32.mrb[0].mxu1 }
 0x1ce   : > { %v467_v22 = vmul.f32 0.35355338, %v310_v21  ;;  %v957_v23 = vpop.f32.mrb[1].mxu1 }
 0x1d0   : > { %v479_v24 = vsel %vm477_vm3, -1e+10, %v467_v22 }
 0x1d1   : > { %v462_v25 = vpop.f32.mrb[2].mxu1  ;;  %v485_v26 = vsel %vm163_vm1, %v479_v24, -inf }
 0x1d2   : > { %v386_v27 = vpop.f32.mrb[2].mxu0  ;;  %v469_v28 = vmul.f32 0.35355338, %v462_v25  ;;  %486 = vmax.xlane.f32.xlu0 %v485_v26  ;;  %v967_v29 = vpop.f32.mrb[3].mxu1 }
 0x1d3   : > { %v468_v30 = vmul.f32 0.35355338, %v386_v27  ;;  %v962_v31 = vpop.f32.mrb[3].mxu0 }
 0x1d4   : > { %v481_v32 = vsel %vm477_vm3, -1e+10, %v469_v28 }
 0x1d5   : > { %v480_v33 = vsel %vm477_vm3, -1e+10, %v468_v30  ;;  %v491_v34 = vsel %vm163_vm1, %v481_v32, -inf }
 0x1d6   : > { %v488_v35 = vsel %vm163_vm1, %v480_v33, -inf  ;;  %492 = vmax.xlane.f32.xlu1 %v491_v34 }
 0x1d7   : > { %489 = vmax.xlane.f32.xlu0 %v488_v35 }
 0x1e7   : > { %602 = vrot.lane.b32.xlu1 %v156_v3, %s1038_s22 }
 0x1ed   : > { %526 = vrot.lane.b32.xlu0 %v1079_v1, %s1038_s22 }
 0x1f0   : > { %v484_v36 = vpop.xlane.xlu1 %483 }
 0x1f1   : > { %v494_v37 = vsub.f32 %v478_v19, %v484_v36 }
 0x1f3   : > { %v498_v38 = vmul.f32 1.442695, %v494_v37 }
 0x1f5   : > { %1007 = vpow2.f32 %v498_v38 }
 0x1ff   : > { %v1008_v39 = vpop.eup %1007 }
 0x200   : > { %v506_v40 = vsel %vm163_vm1, %v1008_v39, 0.0 }
 0x20c   : > { %507 = vadd.xlane.f32.xlu0 %v506_v40 }
 0x25f   : > { %v487_v41 = vpop.xlane.xlu0 %486 }
 0x260   : > { %v495_v42 = vsub.f32 %v479_v24, %v487_v41 }
 0x262   : > { %v500_v43 = vmul.f32 1.442695, %v495_v42 }
 0x263   : > { %v493_v44 = vpop.xlane.xlu1 %492 }
 0x264   : > { %1009 = vpow2.f32 %v500_v43  ;;  %v497_v45 = vsub.f32 %v481_v32, %v493_v44  ;;  %v490_v46 = vpop.xlane.xlu0 %489 }
 0x265   : > { %v496_v47 = vsub.f32 %v480_v33, %v490_v46 }
 0x266   : > { %v504_v48 = vmul.f32 1.442695, %v497_v45 }
 0x267   : > { %v502_v49 = vmul.f32 1.442695, %v496_v47  ;;  %v603_v50 = vpop.permute.xlu1 %602 }
 0x268   : > { %1011 = vpow2.f32 %v504_v48  ;;  %974 = vmatpush3.msra.mxu1 %v603_v50  ;;  %v527_v51 = vpop.permute.xlu0 %526 }
 0x269   : > { %1013 = vpow2.f32 %v502_v49  ;;  %969 = vmatpush3.msra.mxu0 %v527_v51  ;;  %983 = vmatprep.subr.mxu1 %v1031_v0 }
 0x26a   : > { %978 = vmatprep.subr.mxu0 %v1031_v0 }
 0x26e   : > { %v1010_v52 = vpop.eup %1009 }
 0x26f   : > { %v509_v53 = vsel %vm163_vm1, %v1010_v52, 0.0 }
 0x270   : > { %510 = vadd.xlane.f32.xlu1 %v509_v53 }
 0x272   : > { %v1012_v54 = vpop.eup %1011 }
 0x273   : > { %v1014_v55 = vpop.eup %1013  ;;  %v515_v56 = vsel %vm163_vm1, %v1012_v54, 0.0 }
 0x274   : > { %516 = vadd.xlane.f32.xlu1 %v515_v56  ;;  %v512_v57 = vsel %vm163_vm1, %v1014_v55, 0.0 }
 0x275   : > { %513 = vadd.xlane.f32.xlu0 %v512_v57 }
 0x285   : > { %678 = vrot.lane.b32.xlu1 %v1087_v5, %s1038_s22 }
 0x28b   : > { %754 = vrot.lane.b32.xlu0 %v1085_v2, %s1038_s22 }
 0x299   : > { %v508_v58 = vpop.xlane.xlu0 %507 }
 0x29a   : > { %1015 = vrcp.f32 %v508_v58 }
 0x2a4   : > { %v1016_v59 = vpop.eup %1015 }
 0x2a5   : > { %v522_v60 = vmul.f32 %v1016_v59, %v1008_v39 }
 0x2a7   : > { %971 = vmatmul.mubr.msk.f32.vlgmr.msra.gmra.mrb[4].mxu0 %vm163_vm1, %v522_v60 }
 0x2a8   : > { %980 = vmatprep.mubr.msk.f32.mxu0 %vm1032_vm0, %v1031_v0 }
 0x2fd   : > { %v511_v61 = vpop.xlane.xlu1 %510 }
 0x2fe   : > { %1017 = vrcp.f32 %v511_v61 }
 0x301   : > { %v517_v62 = vpop.xlane.xlu1 %516 }
 0x302   : > { %1019 = vrcp.f32 %v517_v62  ;;  %v514_v63 = vpop.xlane.xlu0 %513 }
 0x303   : > { %1021 = vrcp.f32 %v514_v63 }
 0x305   : > { %v679_v1 = vpop.permute.xlu1 %678 }
 0x306   : > { %979 = vmatpush3.msra.mxu0 %v679_v1  ;;  %v755_v2 = vpop.permute.xlu0 %754 }
 0x308   : > { %v1018_v3 = vpop.eup %1017 }
 0x309   : > { %v523_v4 = vmul.f32 %v1018_v3, %v1010_v52 }
 0x30b   : > { %976 = vmatmul.mubr.msk.f32.vlgmr.msra.gmra.mrb[4].mxu1 %vm163_vm1, %v523_v4 }
 0x30c   : > { %v1020_v5 = vpop.eup %1019  ;;  %984 = vmatpush3.msra.mxu1 %v755_v2  ;;  %985 = vmatprep.mubr.msk.f32.mxu1 %vm1032_vm0, %v1031_v0 }
 0x30d   : > { %v1022_v6 = vpop.eup %1021  ;;  %v525_v7 = vmul.f32 %v1020_v5, %v1012_v54 }
 0x30e   : > { %v524_v8 = vmul.f32 %v1022_v6, %v1014_v55 }
 0x30f   : > { %986 = vmatmul.mubr.msk.f32.vlgmr.msra.gmra.mrb[6].mxu1 %vm163_vm1, %v525_v7 }
 0x310   : > { %981 = vmatmul.mubr.msk.f32.vlgmr.msra.gmra.mrb[6].mxu0 %vm163_vm1, %v524_v8 }
 0x37a   : > { %v598_v9 = vpop.f32.mrb[4].mxu0 }
 0x37b   : > { %v972_v10 = vpop.f32.mrb[5].mxu0 }
 0x3de   : > { %v674_v11 = vpop.f32.mrb[4].mxu1 }
 0x3df   : > { %831 = vrot.lane.b32.xlu1 %v674_v11, %s1039_s23  ;;  %v977_v12 = vpop.f32.mrb[5].mxu1 }
 0x3e2   : > { %v826_v13 = vpop.f32.mrb[6].mxu1 }
 0x3e3   : > { %v750_v14 = vpop.f32.mrb[6].mxu0  ;;  %839 = vrot.lane.b32.xlu1 %v826_v13, %s1040_s24  ;;  %v987_v15 = vpop.f32.mrb[7].mxu1 }
 0x3e4   : > { %835 = vrot.lane.b32.xlu0 %v750_v14, %s1041_s25  ;;  %v982_v0 = vpop.f32.mrb[7].mxu0 }
 0x451   : > { %v832_v16 = vpop.permute.xlu1 %831 }
 0x452   : > { %v842_v18 = vsel %vm163_vm1, %v598_v9, %v832_v16 }
 0x455   : > { %v840_v17 = vpop.permute.xlu1 %839 }
 0x456   : > { %v836_v19 = vpop.permute.xlu0 %835 }
 0x457   : > { %v844_v20 = vsel %vm843_vm4, %v842_v18, %v836_v19 }
 0x458   : > { %v846_v21 = vsel %vm845_vm5, %v844_v20, %v840_v17 }
 0x459   : > { %848 = vst.msk [vmem:[%s152_s28] sm:$0xff] %vm847_vm6, %v846_v21 }
 0x45a PF: > { %s12_s9 = sadd.s32 1, %s1029_s9  }
 0x45b   : > { %p9_p4 = scmp.ge.s32.totalorder %s12_s9, 4  }
 0x45d   :  { %11 = sbr.rel (!%p9_p4) target bundleno = 1 (0x1), region = 61 }

// kernel: encoder_forward.11
= control target key start
LH: loop header
LB: loop body
LE: loop exit
PB: predicated region body
PF: predicated region fallthrough
CT: control target
= control target key end

     0   :  { %vm30_vm0 = vcmask 261120   ;;  %v378_v20 = vmov 0.0   ;;  %vm140_vm1 = vcmask 523264   ;;  %s491_s1 = inlined_call_operand.vmem [shape: f32[32,64], index: 1, kind: input, shape index: {}]   ;;  %s492_s0 = inlined_call_operand.vmem [shape: f32[16,32], index: 0, kind: input, shape index: {}]   ;;  %s493_s3 = inlined_call_operand.vmem [shape: f32[64,32], index: 3, kind: input, shape index: {}]   ;;  %s494_s2 = inlined_call_operand.vmem [shape: f32[1,64], index: 2, kind: input, shape index: {}]   ;;  %s495_s4 = inlined_call_operand.vmem [shape: f32[1,32], index: 4, kind: input, shape index: {}]   ;;  %s496_s5 = inlined_call_operand.vmem [shape: f32[1,32], index: 5, kind: input, shape index: {}]   ;;  %s497_s6 = inlined_call_operand.vmem [shape: f32[1,32], index: 6, kind: input, shape index: {}]   ;;  %s498_s7 = inlined_call_operand.vmem [shape: f32[16,32], index: 7, kind: output, shape index: {}]  }
   0x1   :  { %v35_v0 = vld [vmem:[%s491_s1] sm:$0xff]  ;;  %v36_v1 = vld [vmem:[%s491_s1 + $0x8] sm:$0xff]  ;;  %v37_v2 = vld [vmem:[%s491_s1 + $0x10] sm:$0xff]  ;;  %32 = vst.msk [vmem:[#allocation2 + $0x8] sm:$0xff] %vm30_vm0, %v378_v20 }
   0x2   :  { %v349_v3 = vpack.c.bf16 %v36_v1, %v35_v0  ;;  %v38_v4 = vld [vmem:[%s491_s1 + $0x18] sm:$0xff]  ;;  %v33_v5 = vld [vmem:[%s492_s0] sm:$0xff]  ;;  %v133_v8 = vld [vmem:[%s493_s3 + $0x8] sm:$0xff]  ;;  %31 = vst.msk [vmem:[#allocation2] sm:$0xff] %vm30_vm0, %v378_v20 }
   0x3   :  { %v353_v6 = vpack.c.bf16 %v38_v4, %v37_v2  ;;  %327 = vmatprep.mubr.msk.f32.mxu0 %vm30_vm0, %v33_v5  ;;  %v132_v7 = vld [vmem:[%s493_s3] sm:$0xff]  ;;  %v134_v9 = vld [vmem:[%s493_s3 + $0x10] sm:$0xff]  ;;  %v135_v11 = vld [vmem:[%s493_s3 + $0x18] sm:$0xff] }
   0x4   :  { %350 = vmatprep.subr.bf16.mxu0 %v349_v3  ;;  %v357_v10 = vpack.c.bf16 %v133_v8, %v132_v7  ;;  %v361_v12 = vpack.c.bf16 %v135_v11, %v134_v9  ;;  %v136_v13 = vld [vmem:[%s493_s3 + $0x20] sm:$0xff]  ;;  %v137_v14 = vld [vmem:[%s493_s3 + $0x28] sm:$0xff]  ;;  %v138_v17 = vld [vmem:[%s493_s3 + $0x30] sm:$0xff] }
   0x5   :  { %352 = vmatpush3.bf16.msra.mxu0 %v349_v3  ;;  %v365_v15 = vpack.c.bf16 %v137_v14, %v136_v13  ;;  %v34_v16 = vld [vmem:[%s492_s0 + $0x8] sm:$0xff]  ;;  %v139_v18 = vld [vmem:[%s493_s3 + $0x38] sm:$0xff]  ;;  %v295_v21 = vld [vmem:[%s494_s2] ss:$0 sm:$0xff] }
   0x6   :  { %354 = vmatprep.subr.bf16.mxu0 %v353_v6  ;;  %358 = vmatprep.subr.bf16.mxu1 %v357_v10  ;;  %v369_v19 = vpack.c.bf16 %v139_v18, %v138_v17  ;;  %v300_v34 = vld [vmem:[%s495_s4] ss:$0 sm:$0xff] }
   0x7   :  { %360 = vmatpush3.bf16.msra.mxu1 %v357_v10  ;;  %v301_v60 = vld [vmem:[%s496_s5] ss:$0 sm:$0xff] }
   0x8   :  { %362 = vmatprep.subr.bf16.mxu1 %v361_v12  ;;  %v131_v28 = vld [vmem:[#allocation2 + $0x8] sm:$0xff]  ;;  %v302_v62 = vld [vmem:[%s497_s6] ss:$0 sm:$0xff] }
   0x9   :  { %356 = vmatpush3.bf16.msra.mxu0 %v353_v6  ;;  %v130_v29 = vld [vmem:[#allocation2] sm:$0xff] }
   0xb   :  { %364 = vmatpush3.bf16.msra.mxu1 %v361_v12 }
   0xc   :  { %328 = vmatmul.mubr.msk.f32.vlgmr.msra.gmra.mrb[0].mxu0 %vm30_vm0, %v34_v16  ;;  %366 = vmatprep.subr.bf16.mxu1 %v365_v15 }
   0xf   :  { %368 = vmatpush3.bf16.msra.mxu1 %v365_v15 }
  0x10   :  { %370 = vmatprep.subr.bf16.mxu1 %v369_v19 }
  0x13   :  { %372 = vmatpush3.bf16.msra.mxu1 %v369_v19 }
  0xdf   :  { %v329_v22 = vpop.f32.mrb[0].mxu0 }
  0xe0   :  { %v125_v23 = vadd.f32 %v329_v22, %v295_v21  ;;  %v119_v24 = vpop.f32.mrb[1].mxu0 }
  0xe1   :  { %v120_v25 = vadd.f32 %v295_v21, %v119_v24 }
  0xe2   :  { %v129_v27 = vmax.f32 %v125_v23, 0.0 }
  0xe3   :  { %v128_v26 = vmax.f32 %v120_v25, 0.0 }
  0xe5   :  { %346 = vmatprep.mubr.msk.f32.mxu1 %vm140_vm1, %v128_v26 }
  0xe6   :  { %347 = vmatmul.mubr.msk.f32.vlgmr.msra.gmra.mrb[0].mxu1 %vm140_vm1, %v129_v27 }
 0x1b9   :  { %v348_v30 = vpop.f32.mrb[0].mxu1 }
 0x1ba   :  { %v223_v31 = vadd.f32 %v348_v30, %v131_v28  ;;  %v213_v32 = vpop.f32.mrb[1].mxu1 }
 0x1bb   :  { %v222_v33 = vadd.f32 %v213_v32, %v130_v29 }
 0x1bc   :  { %225 = vst.msk [vmem:[#allocation2 + $0x8] sm:$0xff] %vm30_vm0, %v223_v31 }
 0x1bd   :  { %224 = vst.msk [vmem:[#allocation2] sm:$0xff] %vm30_vm0, %v222_v33 }
 0x1c3   :  { %v230_v35 = vld [vmem:[#allocation2 + $0x8] sm:$0xff] }
 0x1c4   :  { %v229_v36 = vld [vmem:[#allocation2] sm:$0xff]  ;;  %v239_v38 = vadd.f32 %v300_v34, %v230_v35 }
 0x1c5   :  { %v238_v37 = vadd.f32 %v300_v34, %v229_v36 }
 0x1c6   :  { %v243_v41 = vadd.f32 %v239_v38, %v34_v16 }
 0x1c7   :  { %v242_v39 = vadd.f32 %v238_v37, %v33_v5 }
 0x1c8   :  { %v247_v42 = vsel %vm30_vm0, %v243_v41, 0.0 }
 0x1c9   :  { %v244_v40 = vsel %vm30_vm0, %v242_v39, 0.0 }
 0x1ca   :  { %245 = vadd.xlane.f32.xlu0 %v244_v40 }
 0x1ce   :  { %248 = vadd.xlane.f32.xlu0 %v247_v42 }
 0x257   :  { %v246_v43 = vpop.xlane.xlu0 %245 }
 0x258   :  { %v251_v44 = vmul.f32 0.03125, %v246_v43 }
 0x25a   :  { %v253_v45 = vsub.f32 %v242_v39, %v251_v44 }
 0x25b   :  { %v249_v46 = vpop.xlane.xlu0 %248 }
 0x25c   :  { %v252_v47 = vmul.f32 0.03125, %v249_v46  ;;  %v255_v48 = vmul.f32 %v253_v45, %v253_v45 }
 0x25e   :  { %v254_v49 = vsub.f32 %v243_v41, %v252_v47  ;;  %v257_v50 = vsel %vm30_vm0, %v255_v48, 0.0 }
 0x25f   :  { %258 = vadd.xlane.f32.xlu1 %v257_v50 }
 0x260   :  { %v256_v51 = vmul.f32 %v254_v49, %v254_v49 }
 0x262   :  { %v260_v52 = vsel %vm30_vm0, %v256_v51, 0.0 }
 0x263   :  { %261 = vadd.xlane.f32.xlu1 %v260_v52 }
 0x2ec   :  { %v259_v53 = vpop.xlane.xlu1 %258 }
 0x2ed   :  { %v263_v54 = vmul.f32 0.03125, %v259_v53 }
 0x2ef   :  { %v265_v55 = vadd.f32 1e-05, %v263_v54 }
 0x2f0   :  { %v262_v56 = vpop.xlane.xlu1 %261 }
 0x2f1   :  { %374 = vrsqrt.f32 %v265_v55  ;;  %v264_v57 = vmul.f32 0.03125, %v262_v56 }
 0x2f3   :  { %v266_v58 = vadd.f32 1e-05, %v264_v57 }
 0x2f5   :  { %376 = vrsqrt.f32 %v266_v58 }
 0x2fb   :  { %v375_v59 = vpop.eup %374 }
 0x2fc   :  { %v269_v61 = vmul.f32 %v375_v59, %v253_v45 }
 0x2fe   :  { %v278_v63 = vmul.f32 %v301_v60, %v269_v61 }
 0x2ff   :  { %v377_v0 = vpop.eup %376 }
 0x300   :  { %v287_v1 = vadd.f32 %v302_v62, %v278_v63  ;;  %v270_v2 = vmul.f32 %v377_v0, %v254_v49 }
 0x302   :  { %289 = vst.msk [vmem:[%s498_s7] sm:$0xff] %vm30_vm0, %v287_v1  ;;  %v279_v3 = vmul.f32 %v301_v60, %v270_v2 }
 0x304   :  { %v288_v4 = vadd.f32 %v302_v62, %v279_v3 }
 0x306   :  { %290 = vst.msk [vmem:[%s498_s7 + $0x8] sm:$0xff] %vm30_vm0, %v288_v4 }

// kernel: encoder_forward.12
= control target key start
LH: loop header
LB: loop body
LE: loop exit
PB: predicated region body
PF: predicated region fallthrough
CT: control target
= control target key end

     0   :  { %vm29_vm0 = vcmask 261120   ;;  %vm18_vm1 = vcmask 785408   ;;  %v165_v3 = vmov 0.0   ;;  %s221_s1 = inlined_call_operand.vmem [shape: f32[32,96], index: 1, kind: input, shape index: {}]   ;;  %s222_s0 = inlined_call_operand.vmem [shape: f32[16,32], index: 0, kind: input, shape index: {}]   ;;  %s223_s2 = inlined_call_operand.vmem [shape: f32[1,96], index: 2, kind: input, shape index: {}]   ;;  %s224_s3 = inlined_call_operand.vmem [shape: f32[16,96], index: 3, kind: output, shape index: {}]  }
   0x1   :  { %v25_v0 = vld [vmem:[%s221_s1] sm:$0xff]  ;;  %v26_v1 = vld [vmem:[%s221_s1 + $0x8] sm:$0xff]  ;;  %v27_v2 = vld [vmem:[%s221_s1 + $0x10] sm:$0xff]  ;;  %20 = vst.msk [vmem:[#allocation2 + $0x8] sm:$0xff] %vm18_vm1, %v165_v3 }
   0x2   :  { %19 = vst.msk [vmem:[#allocation2] sm:$0xff] %vm18_vm1, %v165_v3  ;;  %v156_v4 = vpack.c.bf16 %v26_v1, %v25_v0  ;;  %v28_v5 = vld [vmem:[%s221_s1 + $0x18] sm:$0xff]  ;;  %v23_v6 = vld [vmem:[%s222_s0] sm:$0xff]  ;;  %v24_v8 = vld [vmem:[%s222_s0 + $0x8] sm:$0xff] }
   0x3   :  { %v160_v7 = vpack.c.bf16 %v28_v5, %v27_v2  ;;  %153 = vmatprep.mubr.msk.f32.mxu0 %vm29_vm0, %v23_v6  ;;  %v138_v15 = vld [vmem:[%s223_s2] ss:$0 sm:$0xff] }
   0x4   :  { %157 = vmatprep.subr.bf16.mxu0 %v156_v4 }
   0x5   :  { %159 = vmatpush3.bf16.msra.mxu0 %v156_v4 }
   0x6   :  { %161 = vmatprep.subr.bf16.mxu0 %v160_v7 }
   0x8   :  { %v22_v9 = vld [vmem:[#allocation2 + $0x8] sm:$0xff] }
   0x9   :  { %163 = vmatpush3.bf16.msra.mxu0 %v160_v7  ;;  %v21_v10 = vld [vmem:[#allocation2] sm:$0xff] }
   0xc   :  { %154 = vmatmul.mubr.msk.f32.vlgmr.msra.gmra.mrb[0].mxu0 %vm29_vm0, %v24_v8 }
  0xdf   :  { %v155_v11 = vpop.f32.mrb[0].mxu0 }
  0xe0   :  { %v112_v12 = vadd.f32 %v155_v11, %v22_v9  ;;  %v102_v13 = vpop.f32.mrb[1].mxu0 }
  0xe1   :  { %v111_v14 = vadd.f32 %v102_v13, %v21_v10 }
  0xe2   :  { %115 = vst.msk [vmem:[#allocation2 + $0x8] sm:$0xff] %vm18_vm1, %v112_v12 }
  0xe3   :  { %114 = vst.msk [vmem:[#allocation2] sm:$0xff] %vm18_vm1, %v111_v14 }
  0xe9   :  { %v120_v16 = vld [vmem:[#allocation2 + $0x8] sm:$0xff] }
  0xea   :  { %v129_v17 = vadd.f32 %v138_v15, %v120_v16  ;;  %v119_v18 = vld [vmem:[#allocation2] sm:$0xff] }
  0xeb   :  { %v128_v19 = vadd.f32 %v138_v15, %v119_v18 }
  0xec   :  { %131 = vst.msk [vmem:[%s224_s3 + $0x8] sm:$0xff] %vm18_vm1, %v129_v17 }
  0xed   :  { %130 = vst.msk [vmem:[%s224_s3] sm:$0xff] %vm18_vm1, %v128_v19 }

// kernel: encoder_forward.15
= control target key start
LH: loop header
LB: loop body
LE: loop exit
PB: predicated region body
PF: predicated region fallthrough
CT: control target
= control target key end

     0   :  { %vm31_vm0 = vcmask 261120   ;;  %s540_s0 = inlined_call_operand.vmem [shape: f32[16,32], index: 0, kind: input, shape index: {}]   ;;  %s541_s1 = inlined_call_operand.vmem [shape: f32[32,64], index: 1, kind: input, shape index: {}]   ;;  %s542_s2 = inlined_call_operand.vmem [shape: f32[1,64], index: 2, kind: input, shape index: {}]   ;;  %s543_s3 = inlined_call_operand.vmem [shape: f32[64,32], index: 3, kind: input, shape index: {}]   ;;  %s544_s4 = inlined_call_operand.vmem [shape: f32[1,32], index: 4, kind: input, shape index: {}]   ;;  %s545_s5 = inlined_call_operand.vmem [shape: f32[1,32], index: 5, kind: input, shape index: {}]   ;;  %s546_s6 = inlined_call_operand.vmem [shape: f32[1,32], index: 6, kind: input, shape index: {}]   ;;  %s547_s7 = inlined_call_operand.hbm [shape: f32[16,32], index: 7, kind: output, shape index: {}]  }
   0x1   :  { %v36_v0 = vld [vmem:[%s541_s1] sm:$0xff]  ;;  %v37_v1 = vld [vmem:[%s541_s1 + $0x8] sm:$0xff]  ;;  %v38_v2 = vld [vmem:[%s541_s1 + $0x10] sm:$0xff] }
   0x2   :  { %v362_v3 = vpack.c.bf16 %v37_v1, %v36_v0  ;;  %v39_v4 = vld [vmem:[%s541_s1 + $0x18] sm:$0xff]  ;;  %v34_v5 = vld [vmem:[%s540_s0] sm:$0xff]  ;;  %v134_v8 = vld [vmem:[%s543_s3 + $0x8] sm:$0xff] }
   0x3   :  { %v366_v6 = vpack.c.bf16 %v39_v4, %v38_v2  ;;  %340 = vmatprep.mubr.msk.f32.mxu0 %vm31_vm0, %v34_v5  ;;  %v133_v7 = vld [vmem:[%s543_s3] sm:$0xff]  ;;  %v135_v9 = vld [vmem:[%s543_s3 + $0x10] sm:$0xff]  ;;  %v136_v11 = vld [vmem:[%s543_s3 + $0x18] sm:$0xff] }
   0x4   :  { %363 = vmatprep.subr.bf16.mxu0 %v362_v3  ;;  %v370_v10 = vpack.c.bf16 %v134_v8, %v133_v7  ;;  %v374_v12 = vpack.c.bf16 %v136_v11, %v135_v9  ;;  %v137_v13 = vld [vmem:[%s543_s3 + $0x20] sm:$0xff]  ;;  %v138_v14 = vld [vmem:[%s543_s3 + $0x28] sm:$0xff] }
   0x5   :  { %365 = vmatpush3.bf16.msra.mxu0 %v362_v3 }
   0x6   :  { %12 = vsyncpa [#allocation4], 0  ;;  %367 = vmatprep.subr.bf16.mxu0 %v366_v6  ;;  %371 = vmatprep.subr.bf16.mxu1 %v370_v10  ;;  %v378_v15 = vpack.c.bf16 %v138_v14, %v137_v13  ;;  %v35_v16 = vld [vmem:[%s540_s0 + $0x8] sm:$0xff]  ;;  %v139_v17 = vld [vmem:[%s543_s3 + $0x30] sm:$0xff]  ;;  %v418_v20 = vmov 0.0   ;;  %vm141_vm1 = vcmask 523264  }
   0x7   :  { %373 = vmatpush3.bf16.msra.mxu1 %v370_v10  ;;  %v140_v18 = vld [vmem:[%s543_s3 + $0x38] sm:$0xff]  ;;  %33 = vst.msk [vmem:[#allocation2 + $0x8] sm:$0xff] %vm31_vm0, %v418_v20  ;;  %32 = vst.msk [vmem:[#allocation2] sm:$0xff] %vm31_vm0, %v418_v20  ;;  %v308_v21 = vld [vmem:[%s542_s2] ss:$0 sm:$0xff]  ;;  %s419_s9 = smov [#allocation3]  }
   0x8   :  { %375 = vmatprep.subr.bf16.mxu1 %v374_v12  ;;  %v382_v19 = vpack.c.bf16 %v140_v18, %v139_v17  ;;  %v313_v34 = vld [vmem:[%s544_s4] ss:$0 sm:$0xff]  ;;  %s297_s10 = sshll.u32 %s419_s9, 4  ;;  %s298_s10 = int_to_ptr.vmem [resolvable:$true] %s297_s10 }
   0x9   :  { %369 = vmatpush3.bf16.msra.mxu0 %v366_v6  ;;  %v314_v60 = vld [vmem:[%s545_s5] ss:$0 sm:$0xff]  ;;  %s394_s11 = scalar_lea.vmem %s298_s10, 256  ;;  %p399_p1 = scmp.lt.s32.totalorder %s298_s10, %s298_s10 }
   0xa   :  { %v315_v62 = vld [vmem:[%s546_s6] ss:$0 sm:$0xff]  ;;  %p395_p0 = scmp.ne.s32.totalorder %s298_s10, %s394_s11  ;;  %p400_p2 = scmp.lt.s32.totalorder %s394_s11, %s394_s11 }
   0xb   :  { %377 = vmatpush3.bf16.msra.mxu1 %v374_v12 }
   0xc   :  { %341 = vmatmul.mubr.msk.f32.vlgmr.msra.gmra.mrb[0].mxu0 %vm31_vm0, %v35_v16  ;;  %379 = vmatprep.subr.bf16.mxu1 %v378_v15  ;;  %p401_p3 = por %p400_p2, %p399_p1 }
   0xe   :  { %v132_v28 = vld [vmem:[#allocation2 + $0x8] sm:$0xff]  ;;  %v131_v29 = vld [vmem:[#allocation2] sm:$0xff]  ;;  %p402_p4 = pnand %p401_p3, %p395_p0 }
   0xf   :  { %381 = vmatpush3.bf16.msra.mxu1 %v378_v15 }
  0x10   :  { %383 = vmatprep.subr.bf16.mxu1 %v382_v19 }
  0x13   :  { %385 = vmatpush3.bf16.msra.mxu1 %v382_v19 }
  0xdf   :  { %v342_v22 = vpop.f32.mrb[0].mxu0 }
  0xe0   :  { %v126_v23 = vadd.f32 %v342_v22, %v308_v21  ;;  %v120_v24 = vpop.f32.mrb[1].mxu0 }
  0xe1   :  { %v121_v25 = vadd.f32 %v308_v21, %v120_v24 }
  0xe2   :  { %v130_v27 = vmax.f32 %v126_v23, 0.0 }
  0xe3   :  { %v129_v26 = vmax.f32 %v121_v25, 0.0 }
  0xe5   :  { %359 = vmatprep.mubr.msk.f32.mxu1 %vm141_vm1, %v129_v26 }
  0xe6   :  { %360 = vmatmul.mubr.msk.f32.vlgmr.msra.gmra.mrb[0].mxu1 %vm141_vm1, %v130_v27 }
 0x1b9   :  { %v361_v30 = vpop.f32.mrb[0].mxu1 }
 0x1ba   :  { %v224_v31 = vadd.f32 %v361_v30, %v132_v28  ;;  %v214_v32 = vpop.f32.mrb[1].mxu1 }
 0x1bb   :  { %v223_v33 = vadd.f32 %v214_v32, %v131_v29 }
 0x1bc   :  { %226 = vst.msk [vmem:[#allocation2 + $0x8] sm:$0xff] %vm31_vm0, %v224_v31 }
 0x1bd   :  { %225 = vst.msk [vmem:[#allocation2] sm:$0xff] %vm31_vm0, %v223_v33 }
 0x1c3   :  { %v231_v35 = vld [vmem:[#allocation2 + $0x8] sm:$0xff] }
 0x1c4   :  { %v230_v36 = vld [vmem:[#allocation2] sm:$0xff]  ;;  %v240_v38 = vadd.f32 %v313_v34, %v231_v35 }
 0x1c5   :  { %v239_v37 = vadd.f32 %v313_v34, %v230_v36 }
 0x1c6   :  { %v244_v41 = vadd.f32 %v240_v38, %v35_v16 }
 0x1c7   :  { %v243_v39 = vadd.f32 %v239_v37, %v34_v5 }
 0x1c8   :  { %v248_v42 = vsel %vm31_vm0, %v244_v41, 0.0 }
 0x1c9   :  { %v245_v40 = vsel %vm31_vm0, %v243_v39, 0.0 }
 0x1ca   :  { %246 = vadd.xlane.f32.xlu0 %v245_v40 }
 0x1ce   :  { %249 = vadd.xlane.f32.xlu0 %v248_v42 }
 0x257   :  { %v247_v43 = vpop.xlane.xlu0 %246 }
 0x258   :  { %v252_v44 = vmul.f32 0.03125, %v247_v43 }
 0x25a   :  { %v254_v45 = vsub.f32 %v243_v39, %v252_v44 }
 0x25b   :  { %v250_v46 = vpop.xlane.xlu0 %249 }
 0x25c   :  { %v253_v47 = vmul.f32 0.03125, %v250_v46  ;;  %v256_v48 = vmul.f32 %v254_v45, %v254_v45 }
 0x25e   :  { %v255_v49 = vsub.f32 %v244_v41, %v253_v47  ;;  %v258_v50 = vsel %vm31_vm0, %v256_v48, 0.0 }
 0x25f   :  { %259 = vadd.xlane.f32.xlu1 %v258_v50 }
 0x260   :  { %v257_v51 = vmul.f32 %v255_v49, %v255_v49 }
 0x262   :  { %v261_v52 = vsel %vm31_vm0, %v257_v51, 0.0 }
 0x263   :  { %262 = vadd.xlane.f32.xlu1 %v261_v52 }
 0x2ec   :  { %v260_v53 = vpop.xlane.xlu1 %259 }
 0x2ed   :  { %v264_v54 = vmul.f32 0.03125, %v260_v53 }
 0x2ef   :  { %v266_v55 = vadd.f32 1e-05, %v264_v54 }
 0x2f0   :  { %v263_v56 = vpop.xlane.xlu1 %262 }
 0x2f1   :  { %390 = vrsqrt.f32 %v266_v55  ;;  %v265_v57 = vmul.f32 0.03125, %v263_v56 }
 0x2f3   :  { %v267_v58 = vadd.f32 1e-05, %v265_v57 }
 0x2f5   :  { %392 = vrsqrt.f32 %v267_v58 }
 0x2fb   :  { %v391_v59 = vpop.eup %390 }
 0x2fc   :  { %v270_v61 = vmul.f32 %v391_v59, %v254_v45 }
 0x2fe   :  { %v279_v63 = vmul.f32 %v314_v60, %v270_v61 }
 0x2ff   :  { %v393_v0 = vpop.eup %392 }
 0x300   :  { %v271_v1 = vmul.f32 %v393_v0, %v255_v49  ;;  %v288_v2 = vadd.f32 %v315_v62, %v279_v63 }
 0x302   :  { %v280_v3 = vmul.f32 %v314_v60, %v271_v1  ;;  %290 = vst.msk [vmem:[#allocation3] sm:$0xff] %vm31_vm0, %v288_v2 }
 0x304   :  { %v289_v4 = vadd.f32 %v315_v62, %v280_v3 }
 0x306   :  { %291 = vst.msk [vmem:[#allocation3 + $0x8] sm:$0xff] %vm31_vm0, %v289_v4 }
 0x307   :  { %405 = shalt.err (!%p402_p4)
}
 0x308   :  { %s406_s12 = scalar_lea.hbm %s547_s7, 256 }
 0x309   :  { %p407_p5 = scmp.ne.s32.totalorder %s547_s7, %s406_s12  ;;  %p410_p6 = scmp.lt.u32.totalorder %s406_s12, %s547_s7 }
 0x30b   :  { %p412_p7 = pnand %p410_p6, %p407_p5 }
 0x30d   :  { %415 = shalt.err (!%p412_p7)
}
 0x30e   :  { %s420_s1 = smov 128   ;;  %s421_s17 = smov 8  }
 0x30f   :  { %303 = dma.vmem_to_hbm [thread:$0]  %s298_s10, 256, %s547_s7, [#allocation4], %s420_s1, %s420_s1, %s421_s17  }
 0x310   :  { %416 = dma.done.wait [#allocation4], 256  }
 0x311   :  { %417 = vsyncadd [#allocation4], 4294967040 }
 0x312   :  { %307 = vsyncpa [#allocation4], 1 }

</bundles_post_ra>
